<compile_context>
chip_gen: v7x
topology: tpu7x:2x2x1
jax: 0.10.0
libtpu: 0.0.40
codegen_flags: <defaults>
</compile_context>

<pallas_src>
import jax
import jax.numpy as jnp
import numpy as np
from jax.experimental import pallas as pl
from jax.experimental.pallas import tpu as pltpu


def encoder_ankle_kernel(
    x_ref,        # (B, T, F)    input sequence
    w1xT_ref,     # (T, T)       W1x.T (feature-projection weight, pre-transposed)
    w1hcT_ref,    # (2H, T)      [W1h.T ; W1c.T]  (fused attention state weight)
    b1_ref,       # (1, T)
    w2_ref,       # (1, T)       enc_shaper_net weight
    b2_ref,       # (1, 1)       enc_shaper_net bias
    wgT_ref,      # (F+H, 4H)    [Wih.T ; Whh.T], gate columns reordered to (i,f,o,g)
    bg_ref,       # (1, 4H)      bih + bhh, gate columns reordered to (i,f,o,g)
    attn_ref,     # (B, T, F)    out: attention weights
    hid_ref,      # (B, T, H)    out: encoder hidden states
    xw_ref,       # (B, T, F)    out: weighted inputs
):
    B, T, F = x_ref.shape
    H = hid_ref.shape[-1]

    # ---------------- one-time loads (whole operands are a few vregs) -------------
    x_all = x_ref[...]                              # (B, T, F)
    w1xT = w1xT_ref[...]                            # (T, T)
    w1hcT = w1hcT_ref[...]                          # (2H, T)
    b1 = b1_ref[...]                                # (1, T)
    w2 = w2_ref[...].reshape(1, 1, T)               # (1, 1, T)
    b2 = b2_ref[...]                                # (1, 1)
    wgT = wgT_ref[...]                              # (F+H, 4H)
    bg = bg_ref[...]                                # (1, 4H)

    # --------- loop-invariant feature projection, computed ONCE in-kernel ---------
    # proj[b, f, s] = sum_t x[b, t, f] * W1x[s, t]  =  (x_b^T @ W1x^T)[f, s]
    proj = jnp.stack(
        [jnp.dot(x_all[b].T, w1xT, preferred_element_type=jnp.float32)
         for b in range(B)],
        axis=0)                                     # (B, F, T)

    # Recurrent state carried as values (vregs).
    h = jnp.zeros((B, H), jnp.float32)
    c = jnp.zeros((B, H), jnp.float32)

    alpha_steps, h_steps, xw_steps = [], [], []

    # Statically unrolled time recurrence (T is small).
    for t in range(T):
        # ---------- attention over features (one fused MXU matmul) ----------
        hc = jnp.concatenate([h, c], axis=-1)                        # (B, 2H)
        base = jnp.dot(hc, w1hcT, preferred_element_type=jnp.float32) + b1   # (B, T)
        z = jnp.tanh(base[:, None, :] + proj)                        # (B, F, T)
        score = jnp.sum(z * w2, axis=-1) + b2                        # (B, F)

        # softmax over the feature axis (matches F.softmax(view(-1, F), dim=1))
        m = jnp.max(score, axis=-1, keepdims=True)
        e = jnp.exp(score - m)
        inv = pl.reciprocal(jnp.sum(e, axis=-1, keepdims=True), approx=True)
        alpha = e * inv                                              # (B, F)

        # weighted input at step t (in-vreg slice; x loaded once above)
        x_t = x_all[:, t, :]                                         # (B, F)
        xw = alpha * x_t                                             # (B, F)

        # ---------- one LSTM cell step (one fused MXU matmul, gates i,f,o,g) ------
        xh = jnp.concatenate([xw, h], axis=-1)                       # (B, F+H)
        gates = jnp.dot(xh, wgT, preferred_element_type=jnp.float32) + bg    # (B, 4H)
        sig = jax.nn.sigmoid(gates[:, :3 * H])                       # i | f | o
        g_g = jnp.tanh(gates[:, 3 * H:])                             # g
        i_g = sig[:, 0 * H:1 * H]
        f_g = sig[:, 1 * H:2 * H]
        o_g = sig[:, 2 * H:3 * H]
        c = f_g * c + i_g * g_g
        h = o_g * jnp.tanh(c)

        alpha_steps.append(alpha)
        h_steps.append(h)
        xw_steps.append(xw)

    # ---------- single full (lane-dense within the tile) store per output ---------
    attn_ref[...] = jnp.stack(alpha_steps, axis=1)                   # (B, T, F)
    hid_ref[...] = jnp.stack(h_steps, axis=1)                        # (B, T, H)
    xw_ref[...] = jnp.stack(xw_steps, axis=1)                        # (B, T, F)


def _v7x_like_backend() -> bool:
    """True when the attached TPU has 2 TensorCores per chip (v7x-class)."""
    try:
        kind = jax.devices()[0].device_kind.lower()
    except Exception:
        return False
    return "v7" in kind


def _gate_cols_ifog(w, H):
    """Reorder last-dim gate blocks from PyTorch (i, f, g, o) to (i, f, o, g)."""
    return jnp.concatenate([w[..., :2 * H], w[..., 3 * H:], w[..., 2 * H:3 * H]],
                           axis=-1)


def encoder_ankle_forward(x, p):
    """x: (B, T, F) float32.  p: dict of parameters (see init_params)."""
    B, T, F = x.shape
    H = p['W1h'].shape[1]

    # --- cheap one-time weight prep (transposes / concats / bias sum / reorder) ---
    w1xT = p['W1x'].T                                                  # (T, T)
    w1hcT = jnp.concatenate([p['W1h'].T, p['W1c'].T], axis=0)          # (2H, T)
    wgT = _gate_cols_ifog(
        jnp.concatenate([p['Wih'].T, p['Whh'].T], axis=0), H)          # (F+H, 4H)
    bg = _gate_cols_ifog(p['bih'] + p['bhh'], H)                       # (1, 4H)

    out_shapes = (
        jax.ShapeDtypeStruct((B, T, F), jnp.float32),                  # attn_features_all
        jax.ShapeDtypeStruct((B, T, H), jnp.float32),                  # enc_hidden_all
        jax.ShapeDtypeStruct((B, T, F), jnp.float32),                  # x_weighted
    )
    args = (x, w1xT, w1hcT, p['b1'], p['W2'], p['b2'], wgT, bg)

    if B > 1 and _v7x_like_backend():
        # v7x: shard the independent per-batch recurrences across the 2 TensorCores.
        in_specs = [
            pl.BlockSpec((1, T, F), lambda b: (b, 0, 0)),              # x
            pl.BlockSpec((T, T), lambda b: (0, 0)),                    # w1xT
            pl.BlockSpec((2 * H, T), lambda b: (0, 0)),                # w1hcT
            pl.BlockSpec((1, T), lambda b: (0, 0)),                    # b1
            pl.BlockSpec((1, T), lambda b: (0, 0)),                    # W2
            pl.BlockSpec((1, 1), lambda b: (0, 0)),                    # b2
            pl.BlockSpec((F + H, 4 * H), lambda b: (0, 0)),            # wgT
            pl.BlockSpec((1, 4 * H), lambda b: (0, 0)),                # bg
        ]
        out_specs = (
            pl.BlockSpec((1, T, F), lambda b: (b, 0, 0)),
            pl.BlockSpec((1, T, H), lambda b: (b, 0, 0)),
            pl.BlockSpec((1, T, F), lambda b: (b, 0, 0)),
        )
        return pl.pallas_call(
            encoder_ankle_kernel,
            out_shape=out_shapes,
            grid=(B,),
            in_specs=in_specs,
            out_specs=out_specs,
            compiler_params=pltpu.CompilerParams(
                dimension_semantics=("parallel",)),
        )(*args)

    # v5e / v6e (1 TensorCore): single gridless invocation; everything lives in VMEM.
    return pl.pallas_call(encoder_ankle_kernel, out_shape=out_shapes)(*args)


def init_params(key, F, H, T):
    """Deterministic synthetic parameters with PyTorch-default-style uniform init."""
    ks = jax.random.split(key, 8)
    s1 = 1.0 / np.sqrt(2 * H + T)
    W1 = jax.random.uniform(ks[0], (T, 2 * H + T), jnp.float32, -s1, s1)
    b1 = jax.random.uniform(ks[1], (T,), jnp.float32, -s1, s1)
    s2 = 1.0 / np.sqrt(T)
    W2 = jax.random.uniform(ks[2], (1, T), jnp.float32, -s2, s2)
    b2 = jax.random.uniform(ks[3], (1,), jnp.float32, -s2, s2)
    sl = 1.0 / np.sqrt(H)
    Wih = jax.random.uniform(ks[4], (4 * H, F), jnp.float32, -sl, sl)
    Whh = jax.random.uniform(ks[5], (4 * H, H), jnp.float32, -sl, sl)
    bih = jax.random.uniform(ks[6], (4 * H,), jnp.float32, -sl, sl)
    bhh = jax.random.uniform(ks[7], (4 * H,), jnp.float32, -sl, sl)
    return dict(
        W1h=W1[:, :H], W1c=W1[:, H:2 * H], W1x=W1[:, 2 * H:],
        b1=b1.reshape(1, T), W2=W2, b2=b2.reshape(1, 1),
        Wih=Wih, Whh=Whh, bih=bih.reshape(1, 4 * H), bhh=bhh.reshape(1, 4 * H),
    )


def reference_forward(x, p):
    """Pure-JAX reference with identical semantics (mirrors the PyTorch forward)."""
    B, T, F = x.shape
    H = p['W1h'].shape[1]
    h = jnp.zeros((B, H), jnp.float32)
    c = jnp.zeros((B, H), jnp.float32)
    attn_l, hid_l, xw_l = [], [], []
    for t in range(T):
        base = h @ p['W1h'].T + c @ p['W1c'].T + p['b1']
        proj = jnp.einsum('btf,st->bfs', x, p['W1x'])
        z = jnp.tanh(base[:, None, :] + proj)
        score = jnp.sum(z * p['W2'].reshape(1, 1, T), axis=-1) + p['b2'][0, 0]
        alpha = jax.nn.softmax(score, axis=-1)
        xw = alpha * x[:, t, :]
        gates = xw @ p['Wih'].T + h @ p['Whh'].T + p['bih'] + p['bhh']
        i = jax.nn.sigmoid(gates[:, :H]); f = jax.nn.sigmoid(gates[:, H:2 * H])
        g = jnp.tanh(gates[:, 2 * H:3 * H]); o = jax.nn.sigmoid(gates[:, 3 * H:])
        c = f * c + i * g
        h = o * jnp.tanh(c)
        attn_l.append(alpha); hid_l.append(h); xw_l.append(xw)
    return (jnp.stack(attn_l, 1), jnp.stack(hid_l, 1), jnp.stack(xw_l, 1))


if __name__ == "__main__":
    # model_params: num_features=4, num_hid_units=32, batch_size=2, num_layers=1, seq_length=9
    B, F, H, SEQ_LENGTH = 2, 4, 32, 9
    T = SEQ_LENGTH - 1

    key = jax.random.PRNGKey(0)
    k_in, k_par = jax.random.split(key)
    x = jax.random.normal(k_in, (B, T, F), dtype=jnp.float32)
    params = init_params(k_par, F, H, T)

    fwd = jax.jit(encoder_ankle_forward)
    attn, hid, xw = fwd(x, params)
    jax.block_until_ready((attn, hid, xw))

    attn_r, hid_r, xw_r = reference_forward(x, params)
    # Tolerance is relaxed vs. exact-divide softmax because pl.reciprocal(approx=True)
    # introduces ~2^-12 relative error in the softmax normalization.
    np.testing.assert_allclose(np.asarray(attn), np.asarray(attn_r), rtol=2e-3, atol=2e-3)
    np.testing.assert_allclose(np.asarray(hid), np.asarray(hid_r), rtol=2e-3, atol=2e-3)
    np.testing.assert_allclose(np.asarray(xw), np.asarray(xw_r), rtol=2e-3, atol=2e-3)

    print("KERNEL_OK")
</pallas_src>

<mosaic_0001>
module attributes {stable_mosaic.version = 11 : i64} {
  func.func @encoder_ankle_kernel(%arg0: memref<2x8x4xf32, #tpu.memory_space<vmem>>, %arg1: memref<8x8xf32, #tpu.memory_space<vmem>>, %arg2: memref<64x8xf32, #tpu.memory_space<vmem>>, %arg3: memref<1x8xf32, #tpu.memory_space<vmem>>, %arg4: memref<1x8xf32, #tpu.memory_space<vmem>>, %arg5: memref<1x1xf32, #tpu.memory_space<vmem>>, %arg6: memref<36x128xf32, #tpu.memory_space<vmem>>, %arg7: memref<1x128xf32, #tpu.memory_space<vmem>>, %arg8: memref<2x8x4xf32, #tpu.memory_space<vmem>>, %arg9: memref<2x8x32xf32, #tpu.memory_space<vmem>>, %arg10: memref<2x8x4xf32, #tpu.memory_space<vmem>>) attributes {dimension_semantics = [], scalar_prefetch = 0 : i64, scratch_operands = 0 : i64, tpu.core_type = #tpu.core_type<tc>} {
    %c0 = arith.constant 0 : index
    %c0_0 = arith.constant 0 : index
    %c0_1 = arith.constant 0 : index
    %0 = vector.load %arg0[%c0, %c0_0, %c0_1] : memref<2x8x4xf32, #tpu.memory_space<vmem>>, vector<2x8x4xf32>
    %c0_2 = arith.constant 0 : index
    %c0_3 = arith.constant 0 : index
    %1 = vector.load %arg1[%c0_2, %c0_3] : memref<8x8xf32, #tpu.memory_space<vmem>>, vector<8x8xf32>
    %c0_4 = arith.constant 0 : index
    %c0_5 = arith.constant 0 : index
    %2 = vector.load %arg2[%c0_4, %c0_5] : memref<64x8xf32, #tpu.memory_space<vmem>>, vector<64x8xf32>
    %c0_6 = arith.constant 0 : index
    %c0_7 = arith.constant 0 : index
    %3 = vector.load %arg3[%c0_6, %c0_7] : memref<1x8xf32, #tpu.memory_space<vmem>>, vector<1x8xf32>
    %c0_8 = arith.constant 0 : index
    %c0_9 = arith.constant 0 : index
    %4 = vector.load %arg4[%c0_8, %c0_9] : memref<1x8xf32, #tpu.memory_space<vmem>>, vector<1x8xf32>
    %5 = vector.shape_cast %4 : vector<1x8xf32> to vector<1x1x8xf32>
    %c0_10 = arith.constant 0 : index
    %c0_11 = arith.constant 0 : index
    %6 = vector.load %arg5[%c0_10, %c0_11] : memref<1x1xf32, #tpu.memory_space<vmem>>, vector<1x1xf32>
    %c0_12 = arith.constant 0 : index
    %c0_13 = arith.constant 0 : index
    %7 = vector.load %arg6[%c0_12, %c0_13] : memref<36x128xf32, #tpu.memory_space<vmem>>, vector<36x128xf32>
    %c0_14 = arith.constant 0 : index
    %c0_15 = arith.constant 0 : index
    %8 = vector.load %arg7[%c0_14, %c0_15] : memref<1x128xf32, #tpu.memory_space<vmem>>, vector<1x128xf32>
    %9 = vector.extract_strided_slice %0 {offsets = [0, 0, 0], sizes = [1, 8, 4], strides = [1, 1, 1]} : vector<2x8x4xf32> to vector<1x8x4xf32>
    %10 = vector.shape_cast %9 : vector<1x8x4xf32> to vector<8x4xf32>
    %11 = tpu.transpose %10, [1, 0] : vector<8x4xf32> -> vector<4x8xf32>
    %cst = arith.constant dense<0.000000e+00> : vector<4x8xf32>
    %12 = tpu.matmul %11, %1, %cst {dimension_numbers = #tpu.dot_dimension_numbers<[1], [0], [0], [1], [0, 0, 1, 1], [], []>} : vector<4x8xf32>, vector<8x8xf32>, vector<4x8xf32> -> vector<4x8xf32>
    %13 = vector.extract_strided_slice %0 {offsets = [1, 0, 0], sizes = [1, 8, 4], strides = [1, 1, 1]} : vector<2x8x4xf32> to vector<1x8x4xf32>
    %14 = vector.shape_cast %13 : vector<1x8x4xf32> to vector<8x4xf32>
    %15 = tpu.transpose %14, [1, 0] : vector<8x4xf32> -> vector<4x8xf32>
    %cst_16 = arith.constant dense<0.000000e+00> : vector<4x8xf32>
    %16 = tpu.matmul %15, %1, %cst_16 {dimension_numbers = #tpu.dot_dimension_numbers<[1], [0], [0], [1], [0, 0, 1, 1], [], []>} : vector<4x8xf32>, vector<8x8xf32>, vector<4x8xf32> -> vector<4x8xf32>
    %17 = vector.shape_cast %12 : vector<4x8xf32> to vector<1x4x8xf32>
    %18 = vector.shape_cast %16 : vector<4x8xf32> to vector<1x4x8xf32>
    %19 = tpu.concatenate %17, %18 in 0 : vector<1x4x8xf32>, vector<1x4x8xf32> -> vector<2x4x8xf32>
    %cst_17 = arith.constant 0.000000e+00 : f32
    %20 = vector.broadcast %cst_17 : f32 to vector<2x32xf32>
    %cst_18 = arith.constant 0.000000e+00 : f32
    %21 = vector.broadcast %cst_18 : f32 to vector<2x32xf32>
    %22 = tpu.concatenate %20, %21 in 1 : vector<2x32xf32>, vector<2x32xf32> -> vector<2x64xf32>
    %cst_19 = arith.constant dense<0.000000e+00> : vector<2x8xf32>
    %23 = tpu.matmul %22, %2, %cst_19 {dimension_numbers = #tpu.dot_dimension_numbers<[1], [0], [0], [1], [0, 0, 1, 1], [], []>} : vector<2x64xf32>, vector<64x8xf32>, vector<2x8xf32> -> vector<2x8xf32>
    %24 = vector.broadcast %3 : vector<1x8xf32> to vector<2x8xf32>
    %25 = arith.addf %23, %24 : vector<2x8xf32>
    %26 = vector.shape_cast %25 : vector<2x8xf32> to vector<2x1x8xf32>
    %27 = vector.broadcast %26 : vector<2x1x8xf32> to vector<2x4x8xf32>
    %28 = arith.addf %27, %19 : vector<2x4x8xf32>
    %29 = math.tanh %28 : vector<2x4x8xf32>
    %30 = vector.broadcast %5 : vector<1x1x8xf32> to vector<2x4x8xf32>
    %31 = arith.mulf %29, %30 : vector<2x4x8xf32>
    %cst_20 = arith.constant dense<0.000000e+00> : vector<2x4xf32>
    %32 = vector.multi_reduction <add>, %31, %cst_20 [2] : vector<2x4x8xf32> to vector<2x4xf32>
    %33 = vector.broadcast %6 : vector<1x1xf32> to vector<2x4xf32>
    %34 = arith.addf %32, %33 : vector<2x4xf32>
    %cst_21 = arith.constant dense<0xFF800000> : vector<2xf32>
    %35 = vector.multi_reduction <maximumf>, %34, %cst_21 [1] : vector<2x4xf32> to vector<2xf32>
    %36 = vector.shape_cast %35 : vector<2xf32> to vector<2x1xf32>
    %37 = vector.broadcast %36 : vector<2x1xf32> to vector<2x4xf32>
    %38 = arith.subf %34, %37 : vector<2x4xf32>
    %39 = math.exp %38 : vector<2x4xf32>
    %cst_22 = arith.constant dense<0.000000e+00> : vector<2xf32>
    %40 = vector.multi_reduction <add>, %39, %cst_22 [1] : vector<2x4xf32> to vector<2xf32>
    %41 = vector.shape_cast %40 : vector<2xf32> to vector<2x1xf32>
    %42 = tpu.reciprocal %41 {approx = true} : vector<2x1xf32> -> vector<2x1xf32>
    %43 = vector.broadcast %42 : vector<2x1xf32> to vector<2x4xf32>
    %44 = arith.mulf %39, %43 : vector<2x4xf32>
    %45 = vector.extract_strided_slice %0 {offsets = [0, 0, 0], sizes = [2, 1, 4], strides = [1, 1, 1]} : vector<2x8x4xf32> to vector<2x1x4xf32>
    %46 = vector.shape_cast %45 : vector<2x1x4xf32> to vector<2x4xf32>
    %47 = arith.mulf %44, %46 : vector<2x4xf32>
    %48 = tpu.concatenate %47, %20 in 1 : vector<2x4xf32>, vector<2x32xf32> -> vector<2x36xf32>
    %cst_23 = arith.constant dense<0.000000e+00> : vector<2x128xf32>
    %49 = tpu.matmul %48, %7, %cst_23 {dimension_numbers = #tpu.dot_dimension_numbers<[1], [0], [0], [1], [0, 0, 1, 1], [], []>} : vector<2x36xf32>, vector<36x128xf32>, vector<2x128xf32> -> vector<2x128xf32>
    %50 = vector.broadcast %8 : vector<1x128xf32> to vector<2x128xf32>
    %51 = arith.addf %49, %50 : vector<2x128xf32>
    %52 = vector.extract_strided_slice %51 {offsets = [0, 0], sizes = [2, 96], strides = [1, 1]} : vector<2x128xf32> to vector<2x96xf32>
    %53 = arith.negf %52 : vector<2x96xf32>
    %54 = math.exp %53 : vector<2x96xf32>
    %cst_24 = arith.constant 1.000000e+00 : f32
    %55 = vector.broadcast %cst_24 : f32 to vector<2x96xf32>
    %56 = arith.addf %55, %54 : vector<2x96xf32>
    %57 = arith.divf %55, %56 : vector<2x96xf32>
    %58 = vector.extract_strided_slice %51 {offsets = [0, 96], sizes = [2, 32], strides = [1, 1]} : vector<2x128xf32> to vector<2x32xf32>
    %59 = math.tanh %58 : vector<2x32xf32>
    %60 = vector.extract_strided_slice %57 {offsets = [0, 0], sizes = [2, 32], strides = [1, 1]} : vector<2x96xf32> to vector<2x32xf32>
    %61 = vector.extract_strided_slice %57 {offsets = [0, 32], sizes = [2, 32], strides = [1, 1]} : vector<2x96xf32> to vector<2x32xf32>
    %62 = vector.extract_strided_slice %57 {offsets = [0, 64], sizes = [2, 32], strides = [1, 1]} : vector<2x96xf32> to vector<2x32xf32>
    %63 = arith.mulf %61, %21 : vector<2x32xf32>
    %64 = arith.mulf %60, %59 : vector<2x32xf32>
    %65 = arith.addf %63, %64 : vector<2x32xf32>
    %66 = math.tanh %65 : vector<2x32xf32>
    %67 = arith.mulf %62, %66 : vector<2x32xf32>
    %68 = tpu.concatenate %67, %65 in 1 : vector<2x32xf32>, vector<2x32xf32> -> vector<2x64xf32>
    %cst_25 = arith.constant dense<0.000000e+00> : vector<2x8xf32>
    %69 = tpu.matmul %68, %2, %cst_25 {dimension_numbers = #tpu.dot_dimension_numbers<[1], [0], [0], [1], [0, 0, 1, 1], [], []>} : vector<2x64xf32>, vector<64x8xf32>, vector<2x8xf32> -> vector<2x8xf32>
    %70 = vector.broadcast %3 : vector<1x8xf32> to vector<2x8xf32>
    %71 = arith.addf %69, %70 : vector<2x8xf32>
    %72 = vector.shape_cast %71 : vector<2x8xf32> to vector<2x1x8xf32>
    %73 = vector.broadcast %72 : vector<2x1x8xf32> to vector<2x4x8xf32>
    %74 = arith.addf %73, %19 : vector<2x4x8xf32>
    %75 = math.tanh %74 : vector<2x4x8xf32>
    %76 = vector.broadcast %5 : vector<1x1x8xf32> to vector<2x4x8xf32>
    %77 = arith.mulf %75, %76 : vector<2x4x8xf32>
    %cst_26 = arith.constant dense<0.000000e+00> : vector<2x4xf32>
    %78 = vector.multi_reduction <add>, %77, %cst_26 [2] : vector<2x4x8xf32> to vector<2x4xf32>
    %79 = vector.broadcast %6 : vector<1x1xf32> to vector<2x4xf32>
    %80 = arith.addf %78, %79 : vector<2x4xf32>
    %cst_27 = arith.constant dense<0xFF800000> : vector<2xf32>
    %81 = vector.multi_reduction <maximumf>, %80, %cst_27 [1] : vector<2x4xf32> to vector<2xf32>
    %82 = vector.shape_cast %81 : vector<2xf32> to vector<2x1xf32>
    %83 = vector.broadcast %82 : vector<2x1xf32> to vector<2x4xf32>
    %84 = arith.subf %80, %83 : vector<2x4xf32>
    %85 = math.exp %84 : vector<2x4xf32>
    %cst_28 = arith.constant dense<0.000000e+00> : vector<2xf32>
    %86 = vector.multi_reduction <add>, %85, %cst_28 [1] : vector<2x4xf32> to vector<2xf32>
    %87 = vector.shape_cast %86 : vector<2xf32> to vector<2x1xf32>
    %88 = tpu.reciprocal %87 {approx = true} : vector<2x1xf32> -> vector<2x1xf32>
    %89 = vector.broadcast %88 : vector<2x1xf32> to vector<2x4xf32>
    %90 = arith.mulf %85, %89 : vector<2x4xf32>
    %91 = vector.extract_strided_slice %0 {offsets = [0, 1, 0], sizes = [2, 1, 4], strides = [1, 1, 1]} : vector<2x8x4xf32> to vector<2x1x4xf32>
    %92 = vector.shape_cast %91 : vector<2x1x4xf32> to vector<2x4xf32>
    %93 = arith.mulf %90, %92 : vector<2x4xf32>
    %94 = tpu.concatenate %93, %67 in 1 : vector<2x4xf32>, vector<2x32xf32> -> vector<2x36xf32>
    %cst_29 = arith.constant dense<0.000000e+00> : vector<2x128xf32>
    %95 = tpu.matmul %94, %7, %cst_29 {dimension_numbers = #tpu.dot_dimension_numbers<[1], [0], [0], [1], [0, 0, 1, 1], [], []>} : vector<2x36xf32>, vector<36x128xf32>, vector<2x128xf32> -> vector<2x128xf32>
    %96 = vector.broadcast %8 : vector<1x128xf32> to vector<2x128xf32>
    %97 = arith.addf %95, %96 : vector<2x128xf32>
    %98 = vector.extract_strided_slice %97 {offsets = [0, 0], sizes = [2, 96], strides = [1, 1]} : vector<2x128xf32> to vector<2x96xf32>
    %99 = arith.negf %98 : vector<2x96xf32>
    %100 = math.exp %99 : vector<2x96xf32>
    %cst_30 = arith.constant 1.000000e+00 : f32
    %101 = vector.broadcast %cst_30 : f32 to vector<2x96xf32>
    %102 = arith.addf %101, %100 : vector<2x96xf32>
    %103 = arith.divf %101, %102 : vector<2x96xf32>
    %104 = vector.extract_strided_slice %97 {offsets = [0, 96], sizes = [2, 32], strides = [1, 1]} : vector<2x128xf32> to vector<2x32xf32>
    %105 = math.tanh %104 : vector<2x32xf32>
    %106 = vector.extract_strided_slice %103 {offsets = [0, 0], sizes = [2, 32], strides = [1, 1]} : vector<2x96xf32> to vector<2x32xf32>
    %107 = vector.extract_strided_slice %103 {offsets = [0, 32], sizes = [2, 32], strides = [1, 1]} : vector<2x96xf32> to vector<2x32xf32>
    %108 = vector.extract_strided_slice %103 {offsets = [0, 64], sizes = [2, 32], strides = [1, 1]} : vector<2x96xf32> to vector<2x32xf32>
    %109 = arith.mulf %107, %65 : vector<2x32xf32>
    %110 = arith.mulf %106, %105 : vector<2x32xf32>
    %111 = arith.addf %109, %110 : vector<2x32xf32>
    %112 = math.tanh %111 : vector<2x32xf32>
    %113 = arith.mulf %108, %112 : vector<2x32xf32>
    %114 = tpu.concatenate %113, %111 in 1 : vector<2x32xf32>, vector<2x32xf32> -> vector<2x64xf32>
    %cst_31 = arith.constant dense<0.000000e+00> : vector<2x8xf32>
    %115 = tpu.matmul %114, %2, %cst_31 {dimension_numbers = #tpu.dot_dimension_numbers<[1], [0], [0], [1], [0, 0, 1, 1], [], []>} : vector<2x64xf32>, vector<64x8xf32>, vector<2x8xf32> -> vector<2x8xf32>
    %116 = vector.broadcast %3 : vector<1x8xf32> to vector<2x8xf32>
    %117 = arith.addf %115, %116 : vector<2x8xf32>
    %118 = vector.shape_cast %117 : vector<2x8xf32> to vector<2x1x8xf32>
    %119 = vector.broadcast %118 : vector<2x1x8xf32> to vector<2x4x8xf32>
    %120 = arith.addf %119, %19 : vector<2x4x8xf32>
    %121 = math.tanh %120 : vector<2x4x8xf32>
    %122 = vector.broadcast %5 : vector<1x1x8xf32> to vector<2x4x8xf32>
    %123 = arith.mulf %121, %122 : vector<2x4x8xf32>
    %cst_32 = arith.constant dense<0.000000e+00> : vector<2x4xf32>
    %124 = vector.multi_reduction <add>, %123, %cst_32 [2] : vector<2x4x8xf32> to vector<2x4xf32>
    %125 = vector.broadcast %6 : vector<1x1xf32> to vector<2x4xf32>
    %126 = arith.addf %124, %125 : vector<2x4xf32>
    %cst_33 = arith.constant dense<0xFF800000> : vector<2xf32>
    %127 = vector.multi_reduction <maximumf>, %126, %cst_33 [1] : vector<2x4xf32> to vector<2xf32>
    %128 = vector.shape_cast %127 : vector<2xf32> to vector<2x1xf32>
    %129 = vector.broadcast %128 : vector<2x1xf32> to vector<2x4xf32>
    %130 = arith.subf %126, %129 : vector<2x4xf32>
    %131 = math.exp %130 : vector<2x4xf32>
    %cst_34 = arith.constant dense<0.000000e+00> : vector<2xf32>
    %132 = vector.multi_reduction <add>, %131, %cst_34 [1] : vector<2x4xf32> to vector<2xf32>
    %133 = vector.shape_cast %132 : vector<2xf32> to vector<2x1xf32>
    %134 = tpu.reciprocal %133 {approx = true} : vector<2x1xf32> -> vector<2x1xf32>
    %135 = vector.broadcast %134 : vector<2x1xf32> to vector<2x4xf32>
    %136 = arith.mulf %131, %135 : vector<2x4xf32>
    %137 = vector.extract_strided_slice %0 {offsets = [0, 2, 0], sizes = [2, 1, 4], strides = [1, 1, 1]} : vector<2x8x4xf32> to vector<2x1x4xf32>
    %138 = vector.shape_cast %137 : vector<2x1x4xf32> to vector<2x4xf32>
    %139 = arith.mulf %136, %138 : vector<2x4xf32>
    %140 = tpu.concatenate %139, %113 in 1 : vector<2x4xf32>, vector<2x32xf32> -> vector<2x36xf32>
    %cst_35 = arith.constant dense<0.000000e+00> : vector<2x128xf32>
    %141 = tpu.matmul %140, %7, %cst_35 {dimension_numbers = #tpu.dot_dimension_numbers<[1], [0], [0], [1], [0, 0, 1, 1], [], []>} : vector<2x36xf32>, vector<36x128xf32>, vector<2x128xf32> -> vector<2x128xf32>
    %142 = vector.broadcast %8 : vector<1x128xf32> to vector<2x128xf32>
    %143 = arith.addf %141, %142 : vector<2x128xf32>
    %144 = vector.extract_strided_slice %143 {offsets = [0, 0], sizes = [2, 96], strides = [1, 1]} : vector<2x128xf32> to vector<2x96xf32>
    %145 = arith.negf %144 : vector<2x96xf32>
    %146 = math.exp %145 : vector<2x96xf32>
    %cst_36 = arith.constant 1.000000e+00 : f32
    %147 = vector.broadcast %cst_36 : f32 to vector<2x96xf32>
    %148 = arith.addf %147, %146 : vector<2x96xf32>
    %149 = arith.divf %147, %148 : vector<2x96xf32>
    %150 = vector.extract_strided_slice %143 {offsets = [0, 96], sizes = [2, 32], strides = [1, 1]} : vector<2x128xf32> to vector<2x32xf32>
    %151 = math.tanh %150 : vector<2x32xf32>
    %152 = vector.extract_strided_slice %149 {offsets = [0, 0], sizes = [2, 32], strides = [1, 1]} : vector<2x96xf32> to vector<2x32xf32>
    %153 = vector.extract_strided_slice %149 {offsets = [0, 32], sizes = [2, 32], strides = [1, 1]} : vector<2x96xf32> to vector<2x32xf32>
    %154 = vector.extract_strided_slice %149 {offsets = [0, 64], sizes = [2, 32], strides = [1, 1]} : vector<2x96xf32> to vector<2x32xf32>
    %155 = arith.mulf %153, %111 : vector<2x32xf32>
    %156 = arith.mulf %152, %151 : vector<2x32xf32>
    %157 = arith.addf %155, %156 : vector<2x32xf32>
    %158 = math.tanh %157 : vector<2x32xf32>
    %159 = arith.mulf %154, %158 : vector<2x32xf32>
    %160 = tpu.concatenate %159, %157 in 1 : vector<2x32xf32>, vector<2x32xf32> -> vector<2x64xf32>
    %cst_37 = arith.constant dense<0.000000e+00> : vector<2x8xf32>
    %161 = tpu.matmul %160, %2, %cst_37 {dimension_numbers = #tpu.dot_dimension_numbers<[1], [0], [0], [1], [0, 0, 1, 1], [], []>} : vector<2x64xf32>, vector<64x8xf32>, vector<2x8xf32> -> vector<2x8xf32>
    %162 = vector.broadcast %3 : vector<1x8xf32> to vector<2x8xf32>
    %163 = arith.addf %161, %162 : vector<2x8xf32>
    %164 = vector.shape_cast %163 : vector<2x8xf32> to vector<2x1x8xf32>
    %165 = vector.broadcast %164 : vector<2x1x8xf32> to vector<2x4x8xf32>
    %166 = arith.addf %165, %19 : vector<2x4x8xf32>
    %167 = math.tanh %166 : vector<2x4x8xf32>
    %168 = vector.broadcast %5 : vector<1x1x8xf32> to vector<2x4x8xf32>
    %169 = arith.mulf %167, %168 : vector<2x4x8xf32>
    %cst_38 = arith.constant dense<0.000000e+00> : vector<2x4xf32>
    %170 = vector.multi_reduction <add>, %169, %cst_38 [2] : vector<2x4x8xf32> to vector<2x4xf32>
    %171 = vector.broadcast %6 : vector<1x1xf32> to vector<2x4xf32>
    %172 = arith.addf %170, %171 : vector<2x4xf32>
    %cst_39 = arith.constant dense<0xFF800000> : vector<2xf32>
    %173 = vector.multi_reduction <maximumf>, %172, %cst_39 [1] : vector<2x4xf32> to vector<2xf32>
    %174 = vector.shape_cast %173 : vector<2xf32> to vector<2x1xf32>
    %175 = vector.broadcast %174 : vector<2x1xf32> to vector<2x4xf32>
    %176 = arith.subf %172, %175 : vector<2x4xf32>
    %177 = math.exp %176 : vector<2x4xf32>
    %cst_40 = arith.constant dense<0.000000e+00> : vector<2xf32>
    %178 = vector.multi_reduction <add>, %177, %cst_40 [1] : vector<2x4xf32> to vector<2xf32>
    %179 = vector.shape_cast %178 : vector<2xf32> to vector<2x1xf32>
    %180 = tpu.reciprocal %179 {approx = true} : vector<2x1xf32> -> vector<2x1xf32>
    %181 = vector.broadcast %180 : vector<2x1xf32> to vector<2x4xf32>
    %182 = arith.mulf %177, %181 : vector<2x4xf32>
    %183 = vector.extract_strided_slice %0 {offsets = [0, 3, 0], sizes = [2, 1, 4], strides = [1, 1, 1]} : vector<2x8x4xf32> to vector<2x1x4xf32>
    %184 = vector.shape_cast %183 : vector<2x1x4xf32> to vector<2x4xf32>
    %185 = arith.mulf %182, %184 : vector<2x4xf32>
    %186 = tpu.concatenate %185, %159 in 1 : vector<2x4xf32>, vector<2x32xf32> -> vector<2x36xf32>
    %cst_41 = arith.constant dense<0.000000e+00> : vector<2x128xf32>
    %187 = tpu.matmul %186, %7, %cst_41 {dimension_numbers = #tpu.dot_dimension_numbers<[1], [0], [0], [1], [0, 0, 1, 1], [], []>} : vector<2x36xf32>, vector<36x128xf32>, vector<2x128xf32> -> vector<2x128xf32>
    %188 = vector.broadcast %8 : vector<1x128xf32> to vector<2x128xf32>
    %189 = arith.addf %187, %188 : vector<2x128xf32>
    %190 = vector.extract_strided_slice %189 {offsets = [0, 0], sizes = [2, 96], strides = [1, 1]} : vector<2x128xf32> to vector<2x96xf32>
    %191 = arith.negf %190 : vector<2x96xf32>
    %192 = math.exp %191 : vector<2x96xf32>
    %cst_42 = arith.constant 1.000000e+00 : f32
    %193 = vector.broadcast %cst_42 : f32 to vector<2x96xf32>
    %194 = arith.addf %193, %192 : vector<2x96xf32>
    %195 = arith.divf %193, %194 : vector<2x96xf32>
    %196 = vector.extract_strided_slice %189 {offsets = [0, 96], sizes = [2, 32], strides = [1, 1]} : vector<2x128xf32> to vector<2x32xf32>
    %197 = math.tanh %196 : vector<2x32xf32>
    %198 = vector.extract_strided_slice %195 {offsets = [0, 0], sizes = [2, 32], strides = [1, 1]} : vector<2x96xf32> to vector<2x32xf32>
    %199 = vector.extract_strided_slice %195 {offsets = [0, 32], sizes = [2, 32], strides = [1, 1]} : vector<2x96xf32> to vector<2x32xf32>
    %200 = vector.extract_strided_slice %195 {offsets = [0, 64], sizes = [2, 32], strides = [1, 1]} : vector<2x96xf32> to vector<2x32xf32>
    %201 = arith.mulf %199, %157 : vector<2x32xf32>
    %202 = arith.mulf %198, %197 : vector<2x32xf32>
    %203 = arith.addf %201, %202 : vector<2x32xf32>
    %204 = math.tanh %203 : vector<2x32xf32>
    %205 = arith.mulf %200, %204 : vector<2x32xf32>
    %206 = tpu.concatenate %205, %203 in 1 : vector<2x32xf32>, vector<2x32xf32> -> vector<2x64xf32>
    %cst_43 = arith.constant dense<0.000000e+00> : vector<2x8xf32>
    %207 = tpu.matmul %206, %2, %cst_43 {dimension_numbers = #tpu.dot_dimension_numbers<[1], [0], [0], [1], [0, 0, 1, 1], [], []>} : vector<2x64xf32>, vector<64x8xf32>, vector<2x8xf32> -> vector<2x8xf32>
    %208 = vector.broadcast %3 : vector<1x8xf32> to vector<2x8xf32>
    %209 = arith.addf %207, %208 : vector<2x8xf32>
    %210 = vector.shape_cast %209 : vector<2x8xf32> to vector<2x1x8xf32>
    %211 = vector.broadcast %210 : vector<2x1x8xf32> to vector<2x4x8xf32>
    %212 = arith.addf %211, %19 : vector<2x4x8xf32>
    %213 = math.tanh %212 : vector<2x4x8xf32>
    %214 = vector.broadcast %5 : vector<1x1x8xf32> to vector<2x4x8xf32>
    %215 = arith.mulf %213, %214 : vector<2x4x8xf32>
    %cst_44 = arith.constant dense<0.000000e+00> : vector<2x4xf32>
    %216 = vector.multi_reduction <add>, %215, %cst_44 [2] : vector<2x4x8xf32> to vector<2x4xf32>
    %217 = vector.broadcast %6 : vector<1x1xf32> to vector<2x4xf32>
    %218 = arith.addf %216, %217 : vector<2x4xf32>
    %cst_45 = arith.constant dense<0xFF800000> : vector<2xf32>
    %219 = vector.multi_reduction <maximumf>, %218, %cst_45 [1] : vector<2x4xf32> to vector<2xf32>
    %220 = vector.shape_cast %219 : vector<2xf32> to vector<2x1xf32>
    %221 = vector.broadcast %220 : vector<2x1xf32> to vector<2x4xf32>
    %222 = arith.subf %218, %221 : vector<2x4xf32>
    %223 = math.exp %222 : vector<2x4xf32>
    %cst_46 = arith.constant dense<0.000000e+00> : vector<2xf32>
    %224 = vector.multi_reduction <add>, %223, %cst_46 [1] : vector<2x4xf32> to vector<2xf32>
    %225 = vector.shape_cast %224 : vector<2xf32> to vector<2x1xf32>
    %226 = tpu.reciprocal %225 {approx = true} : vector<2x1xf32> -> vector<2x1xf32>
    %227 = vector.broadcast %226 : vector<2x1xf32> to vector<2x4xf32>
    %228 = arith.mulf %223, %227 : vector<2x4xf32>
    %229 = vector.extract_strided_slice %0 {offsets = [0, 4, 0], sizes = [2, 1, 4], strides = [1, 1, 1]} : vector<2x8x4xf32> to vector<2x1x4xf32>
    %230 = vector.shape_cast %229 : vector<2x1x4xf32> to vector<2x4xf32>
    %231 = arith.mulf %228, %230 : vector<2x4xf32>
    %232 = tpu.concatenate %231, %205 in 1 : vector<2x4xf32>, vector<2x32xf32> -> vector<2x36xf32>
    %cst_47 = arith.constant dense<0.000000e+00> : vector<2x128xf32>
    %233 = tpu.matmul %232, %7, %cst_47 {dimension_numbers = #tpu.dot_dimension_numbers<[1], [0], [0], [1], [0, 0, 1, 1], [], []>} : vector<2x36xf32>, vector<36x128xf32>, vector<2x128xf32> -> vector<2x128xf32>
    %234 = vector.broadcast %8 : vector<1x128xf32> to vector<2x128xf32>
    %235 = arith.addf %233, %234 : vector<2x128xf32>
    %236 = vector.extract_strided_slice %235 {offsets = [0, 0], sizes = [2, 96], strides = [1, 1]} : vector<2x128xf32> to vector<2x96xf32>
    %237 = arith.negf %236 : vector<2x96xf32>
    %238 = math.exp %237 : vector<2x96xf32>
    %cst_48 = arith.constant 1.000000e+00 : f32
    %239 = vector.broadcast %cst_48 : f32 to vector<2x96xf32>
    %240 = arith.addf %239, %238 : vector<2x96xf32>
    %241 = arith.divf %239, %240 : vector<2x96xf32>
    %242 = vector.extract_strided_slice %235 {offsets = [0, 96], sizes = [2, 32], strides = [1, 1]} : vector<2x128xf32> to vector<2x32xf32>
    %243 = math.tanh %242 : vector<2x32xf32>
    %244 = vector.extract_strided_slice %241 {offsets = [0, 0], sizes = [2, 32], strides = [1, 1]} : vector<2x96xf32> to vector<2x32xf32>
    %245 = vector.extract_strided_slice %241 {offsets = [0, 32], sizes = [2, 32], strides = [1, 1]} : vector<2x96xf32> to vector<2x32xf32>
    %246 = vector.extract_strided_slice %241 {offsets = [0, 64], sizes = [2, 32], strides = [1, 1]} : vector<2x96xf32> to vector<2x32xf32>
    %247 = arith.mulf %245, %203 : vector<2x32xf32>
    %248 = arith.mulf %244, %243 : vector<2x32xf32>
    %249 = arith.addf %247, %248 : vector<2x32xf32>
    %250 = math.tanh %249 : vector<2x32xf32>
    %251 = arith.mulf %246, %250 : vector<2x32xf32>
    %252 = tpu.concatenate %251, %249 in 1 : vector<2x32xf32>, vector<2x32xf32> -> vector<2x64xf32>
    %cst_49 = arith.constant dense<0.000000e+00> : vector<2x8xf32>
    %253 = tpu.matmul %252, %2, %cst_49 {dimension_numbers = #tpu.dot_dimension_numbers<[1], [0], [0], [1], [0, 0, 1, 1], [], []>} : vector<2x64xf32>, vector<64x8xf32>, vector<2x8xf32> -> vector<2x8xf32>
    %254 = vector.broadcast %3 : vector<1x8xf32> to vector<2x8xf32>
    %255 = arith.addf %253, %254 : vector<2x8xf32>
    %256 = vector.shape_cast %255 : vector<2x8xf32> to vector<2x1x8xf32>
    %257 = vector.broadcast %256 : vector<2x1x8xf32> to vector<2x4x8xf32>
    %258 = arith.addf %257, %19 : vector<2x4x8xf32>
    %259 = math.tanh %258 : vector<2x4x8xf32>
    %260 = vector.broadcast %5 : vector<1x1x8xf32> to vector<2x4x8xf32>
    %261 = arith.mulf %259, %260 : vector<2x4x8xf32>
    %cst_50 = arith.constant dense<0.000000e+00> : vector<2x4xf32>
    %262 = vector.multi_reduction <add>, %261, %cst_50 [2] : vector<2x4x8xf32> to vector<2x4xf32>
    %263 = vector.broadcast %6 : vector<1x1xf32> to vector<2x4xf32>
    %264 = arith.addf %262, %263 : vector<2x4xf32>
    %cst_51 = arith.constant dense<0xFF800000> : vector<2xf32>
    %265 = vector.multi_reduction <maximumf>, %264, %cst_51 [1] : vector<2x4xf32> to vector<2xf32>
    %266 = vector.shape_cast %265 : vector<2xf32> to vector<2x1xf32>
    %267 = vector.broadcast %266 : vector<2x1xf32> to vector<2x4xf32>
    %268 = arith.subf %264, %267 : vector<2x4xf32>
    %269 = math.exp %268 : vector<2x4xf32>
    %cst_52 = arith.constant dense<0.000000e+00> : vector<2xf32>
    %270 = vector.multi_reduction <add>, %269, %cst_52 [1] : vector<2x4xf32> to vector<2xf32>
    %271 = vector.shape_cast %270 : vector<2xf32> to vector<2x1xf32>
    %272 = tpu.reciprocal %271 {approx = true} : vector<2x1xf32> -> vector<2x1xf32>
    %273 = vector.broadcast %272 : vector<2x1xf32> to vector<2x4xf32>
    %274 = arith.mulf %269, %273 : vector<2x4xf32>
    %275 = vector.extract_strided_slice %0 {offsets = [0, 5, 0], sizes = [2, 1, 4], strides = [1, 1, 1]} : vector<2x8x4xf32> to vector<2x1x4xf32>
    %276 = vector.shape_cast %275 : vector<2x1x4xf32> to vector<2x4xf32>
    %277 = arith.mulf %274, %276 : vector<2x4xf32>
    %278 = tpu.concatenate %277, %251 in 1 : vector<2x4xf32>, vector<2x32xf32> -> vector<2x36xf32>
    %cst_53 = arith.constant dense<0.000000e+00> : vector<2x128xf32>
    %279 = tpu.matmul %278, %7, %cst_53 {dimension_numbers = #tpu.dot_dimension_numbers<[1], [0], [0], [1], [0, 0, 1, 1], [], []>} : vector<2x36xf32>, vector<36x128xf32>, vector<2x128xf32> -> vector<2x128xf32>
    %280 = vector.broadcast %8 : vector<1x128xf32> to vector<2x128xf32>
    %281 = arith.addf %279, %280 : vector<2x128xf32>
    %282 = vector.extract_strided_slice %281 {offsets = [0, 0], sizes = [2, 96], strides = [1, 1]} : vector<2x128xf32> to vector<2x96xf32>
    %283 = arith.negf %282 : vector<2x96xf32>
    %284 = math.exp %283 : vector<2x96xf32>
    %cst_54 = arith.constant 1.000000e+00 : f32
    %285 = vector.broadcast %cst_54 : f32 to vector<2x96xf32>
    %286 = arith.addf %285, %284 : vector<2x96xf32>
    %287 = arith.divf %285, %286 : vector<2x96xf32>
    %288 = vector.extract_strided_slice %281 {offsets = [0, 96], sizes = [2, 32], strides = [1, 1]} : vector<2x128xf32> to vector<2x32xf32>
    %289 = math.tanh %288 : vector<2x32xf32>
    %290 = vector.extract_strided_slice %287 {offsets = [0, 0], sizes = [2, 32], strides = [1, 1]} : vector<2x96xf32> to vector<2x32xf32>
    %291 = vector.extract_strided_slice %287 {offsets = [0, 32], sizes = [2, 32], strides = [1, 1]} : vector<2x96xf32> to vector<2x32xf32>
    %292 = vector.extract_strided_slice %287 {offsets = [0, 64], sizes = [2, 32], strides = [1, 1]} : vector<2x96xf32> to vector<2x32xf32>
    %293 = arith.mulf %291, %249 : vector<2x32xf32>
    %294 = arith.mulf %290, %289 : vector<2x32xf32>
    %295 = arith.addf %293, %294 : vector<2x32xf32>
    %296 = math.tanh %295 : vector<2x32xf32>
    %297 = arith.mulf %292, %296 : vector<2x32xf32>
    %298 = tpu.concatenate %297, %295 in 1 : vector<2x32xf32>, vector<2x32xf32> -> vector<2x64xf32>
    %cst_55 = arith.constant dense<0.000000e+00> : vector<2x8xf32>
    %299 = tpu.matmul %298, %2, %cst_55 {dimension_numbers = #tpu.dot_dimension_numbers<[1], [0], [0], [1], [0, 0, 1, 1], [], []>} : vector<2x64xf32>, vector<64x8xf32>, vector<2x8xf32> -> vector<2x8xf32>
    %300 = vector.broadcast %3 : vector<1x8xf32> to vector<2x8xf32>
    %301 = arith.addf %299, %300 : vector<2x8xf32>
    %302 = vector.shape_cast %301 : vector<2x8xf32> to vector<2x1x8xf32>
    %303 = vector.broadcast %302 : vector<2x1x8xf32> to vector<2x4x8xf32>
    %304 = arith.addf %303, %19 : vector<2x4x8xf32>
    %305 = math.tanh %304 : vector<2x4x8xf32>
    %306 = vector.broadcast %5 : vector<1x1x8xf32> to vector<2x4x8xf32>
    %307 = arith.mulf %305, %306 : vector<2x4x8xf32>
    %cst_56 = arith.constant dense<0.000000e+00> : vector<2x4xf32>
    %308 = vector.multi_reduction <add>, %307, %cst_56 [2] : vector<2x4x8xf32> to vector<2x4xf32>
    %309 = vector.broadcast %6 : vector<1x1xf32> to vector<2x4xf32>
    %310 = arith.addf %308, %309 : vector<2x4xf32>
    %cst_57 = arith.constant dense<0xFF800000> : vector<2xf32>
    %311 = vector.multi_reduction <maximumf>, %310, %cst_57 [1] : vector<2x4xf32> to vector<2xf32>
    %312 = vector.shape_cast %311 : vector<2xf32> to vector<2x1xf32>
    %313 = vector.broadcast %312 : vector<2x1xf32> to vector<2x4xf32>
    %314 = arith.subf %310, %313 : vector<2x4xf32>
    %315 = math.exp %314 : vector<2x4xf32>
    %cst_58 = arith.constant dense<0.000000e+00> : vector<2xf32>
    %316 = vector.multi_reduction <add>, %315, %cst_58 [1] : vector<2x4xf32> to vector<2xf32>
    %317 = vector.shape_cast %316 : vector<2xf32> to vector<2x1xf32>
    %318 = tpu.reciprocal %317 {approx = true} : vector<2x1xf32> -> vector<2x1xf32>
    %319 = vector.broadcast %318 : vector<2x1xf32> to vector<2x4xf32>
    %320 = arith.mulf %315, %319 : vector<2x4xf32>
    %321 = vector.extract_strided_slice %0 {offsets = [0, 6, 0], sizes = [2, 1, 4], strides = [1, 1, 1]} : vector<2x8x4xf32> to vector<2x1x4xf32>
    %322 = vector.shape_cast %321 : vector<2x1x4xf32> to vector<2x4xf32>
    %323 = arith.mulf %320, %322 : vector<2x4xf32>
    %324 = tpu.concatenate %323, %297 in 1 : vector<2x4xf32>, vector<2x32xf32> -> vector<2x36xf32>
    %cst_59 = arith.constant dense<0.000000e+00> : vector<2x128xf32>
    %325 = tpu.matmul %324, %7, %cst_59 {dimension_numbers = #tpu.dot_dimension_numbers<[1], [0], [0], [1], [0, 0, 1, 1], [], []>} : vector<2x36xf32>, vector<36x128xf32>, vector<2x128xf32> -> vector<2x128xf32>
    %326 = vector.broadcast %8 : vector<1x128xf32> to vector<2x128xf32>
    %327 = arith.addf %325, %326 : vector<2x128xf32>
    %328 = vector.extract_strided_slice %327 {offsets = [0, 0], sizes = [2, 96], strides = [1, 1]} : vector<2x128xf32> to vector<2x96xf32>
    %329 = arith.negf %328 : vector<2x96xf32>
    %330 = math.exp %329 : vector<2x96xf32>
    %cst_60 = arith.constant 1.000000e+00 : f32
    %331 = vector.broadcast %cst_60 : f32 to vector<2x96xf32>
    %332 = arith.addf %331, %330 : vector<2x96xf32>
    %333 = arith.divf %331, %332 : vector<2x96xf32>
    %334 = vector.extract_strided_slice %327 {offsets = [0, 96], sizes = [2, 32], strides = [1, 1]} : vector<2x128xf32> to vector<2x32xf32>
    %335 = math.tanh %334 : vector<2x32xf32>
    %336 = vector.extract_strided_slice %333 {offsets = [0, 0], sizes = [2, 32], strides = [1, 1]} : vector<2x96xf32> to vector<2x32xf32>
    %337 = vector.extract_strided_slice %333 {offsets = [0, 32], sizes = [2, 32], strides = [1, 1]} : vector<2x96xf32> to vector<2x32xf32>
    %338 = vector.extract_strided_slice %333 {offsets = [0, 64], sizes = [2, 32], strides = [1, 1]} : vector<2x96xf32> to vector<2x32xf32>
    %339 = arith.mulf %337, %295 : vector<2x32xf32>
    %340 = arith.mulf %336, %335 : vector<2x32xf32>
    %341 = arith.addf %339, %340 : vector<2x32xf32>
    %342 = math.tanh %341 : vector<2x32xf32>
    %343 = arith.mulf %338, %342 : vector<2x32xf32>
    %344 = tpu.concatenate %343, %341 in 1 : vector<2x32xf32>, vector<2x32xf32> -> vector<2x64xf32>
    %cst_61 = arith.constant dense<0.000000e+00> : vector<2x8xf32>
    %345 = tpu.matmul %344, %2, %cst_61 {dimension_numbers = #tpu.dot_dimension_numbers<[1], [0], [0], [1], [0, 0, 1, 1], [], []>} : vector<2x64xf32>, vector<64x8xf32>, vector<2x8xf32> -> vector<2x8xf32>
    %346 = vector.broadcast %3 : vector<1x8xf32> to vector<2x8xf32>
    %347 = arith.addf %345, %346 : vector<2x8xf32>
    %348 = vector.shape_cast %347 : vector<2x8xf32> to vector<2x1x8xf32>
    %349 = vector.broadcast %348 : vector<2x1x8xf32> to vector<2x4x8xf32>
    %350 = arith.addf %349, %19 : vector<2x4x8xf32>
    %351 = math.tanh %350 : vector<2x4x8xf32>
    %352 = vector.broadcast %5 : vector<1x1x8xf32> to vector<2x4x8xf32>
    %353 = arith.mulf %351, %352 : vector<2x4x8xf32>
    %cst_62 = arith.constant dense<0.000000e+00> : vector<2x4xf32>
    %354 = vector.multi_reduction <add>, %353, %cst_62 [2] : vector<2x4x8xf32> to vector<2x4xf32>
    %355 = vector.broadcast %6 : vector<1x1xf32> to vector<2x4xf32>
    %356 = arith.addf %354, %355 : vector<2x4xf32>
    %cst_63 = arith.constant dense<0xFF800000> : vector<2xf32>
    %357 = vector.multi_reduction <maximumf>, %356, %cst_63 [1] : vector<2x4xf32> to vector<2xf32>
    %358 = vector.shape_cast %357 : vector<2xf32> to vector<2x1xf32>
    %359 = vector.broadcast %358 : vector<2x1xf32> to vector<2x4xf32>
    %360 = arith.subf %356, %359 : vector<2x4xf32>
    %361 = math.exp %360 : vector<2x4xf32>
    %cst_64 = arith.constant dense<0.000000e+00> : vector<2xf32>
    %362 = vector.multi_reduction <add>, %361, %cst_64 [1] : vector<2x4xf32> to vector<2xf32>
    %363 = vector.shape_cast %362 : vector<2xf32> to vector<2x1xf32>
    %364 = tpu.reciprocal %363 {approx = true} : vector<2x1xf32> -> vector<2x1xf32>
    %365 = vector.broadcast %364 : vector<2x1xf32> to vector<2x4xf32>
    %366 = arith.mulf %361, %365 : vector<2x4xf32>
    %367 = vector.extract_strided_slice %0 {offsets = [0, 7, 0], sizes = [2, 1, 4], strides = [1, 1, 1]} : vector<2x8x4xf32> to vector<2x1x4xf32>
    %368 = vector.shape_cast %367 : vector<2x1x4xf32> to vector<2x4xf32>
    %369 = arith.mulf %366, %368 : vector<2x4xf32>
    %370 = tpu.concatenate %369, %343 in 1 : vector<2x4xf32>, vector<2x32xf32> -> vector<2x36xf32>
    %cst_65 = arith.constant dense<0.000000e+00> : vector<2x128xf32>
    %371 = tpu.matmul %370, %7, %cst_65 {dimension_numbers = #tpu.dot_dimension_numbers<[1], [0], [0], [1], [0, 0, 1, 1], [], []>} : vector<2x36xf32>, vector<36x128xf32>, vector<2x128xf32> -> vector<2x128xf32>
    %372 = vector.broadcast %8 : vector<1x128xf32> to vector<2x128xf32>
    %373 = arith.addf %371, %372 : vector<2x128xf32>
    %374 = vector.extract_strided_slice %373 {offsets = [0, 0], sizes = [2, 96], strides = [1, 1]} : vector<2x128xf32> to vector<2x96xf32>
    %375 = arith.negf %374 : vector<2x96xf32>
    %376 = math.exp %375 : vector<2x96xf32>
    %cst_66 = arith.constant 1.000000e+00 : f32
    %377 = vector.broadcast %cst_66 : f32 to vector<2x96xf32>
    %378 = arith.addf %377, %376 : vector<2x96xf32>
    %379 = arith.divf %377, %378 : vector<2x96xf32>
    %380 = vector.extract_strided_slice %373 {offsets = [0, 96], sizes = [2, 32], strides = [1, 1]} : vector<2x128xf32> to vector<2x32xf32>
    %381 = math.tanh %380 : vector<2x32xf32>
    %382 = vector.extract_strided_slice %379 {offsets = [0, 0], sizes = [2, 32], strides = [1, 1]} : vector<2x96xf32> to vector<2x32xf32>
    %383 = vector.extract_strided_slice %379 {offsets = [0, 32], sizes = [2, 32], strides = [1, 1]} : vector<2x96xf32> to vector<2x32xf32>
    %384 = vector.extract_strided_slice %379 {offsets = [0, 64], sizes = [2, 32], strides = [1, 1]} : vector<2x96xf32> to vector<2x32xf32>
    %385 = arith.mulf %383, %341 : vector<2x32xf32>
    %386 = arith.mulf %382, %381 : vector<2x32xf32>
    %387 = arith.addf %385, %386 : vector<2x32xf32>
    %388 = math.tanh %387 : vector<2x32xf32>
    %389 = arith.mulf %384, %388 : vector<2x32xf32>
    %390 = vector.shape_cast %44 : vector<2x4xf32> to vector<2x1x4xf32>
    %391 = vector.shape_cast %90 : vector<2x4xf32> to vector<2x1x4xf32>
    %392 = vector.shape_cast %136 : vector<2x4xf32> to vector<2x1x4xf32>
    %393 = vector.shape_cast %182 : vector<2x4xf32> to vector<2x1x4xf32>
    %394 = vector.shape_cast %228 : vector<2x4xf32> to vector<2x1x4xf32>
    %395 = vector.shape_cast %274 : vector<2x4xf32> to vector<2x1x4xf32>
    %396 = vector.shape_cast %320 : vector<2x4xf32> to vector<2x1x4xf32>
    %397 = vector.shape_cast %366 : vector<2x4xf32> to vector<2x1x4xf32>
    %398 = tpu.concatenate %390, %391, %392, %393, %394, %395, %396, %397 in 1 : vector<2x1x4xf32>, vector<2x1x4xf32>, vector<2x1x4xf32>, vector<2x1x4xf32>, vector<2x1x4xf32>, vector<2x1x4xf32>, vector<2x1x4xf32>, vector<2x1x4xf32> -> vector<2x8x4xf32>
    %c0_67 = arith.constant 0 : index
    %c0_68 = arith.constant 0 : index
    %c0_69 = arith.constant 0 : index
    %399 = vector.load %arg8[%c0_67, %c0_68, %c0_69] : memref<2x8x4xf32, #tpu.memory_space<vmem>>, vector<2x8x4xf32>
    tpu.vector_store %arg8[%c0_67, %c0_68, %c0_69], %398 {strides = array<i32>} : memref<2x8x4xf32, #tpu.memory_space<vmem>>, vector<2x8x4xf32>,
    %400 = vector.shape_cast %67 : vector<2x32xf32> to vector<2x1x32xf32>
    %401 = vector.shape_cast %113 : vector<2x32xf32> to vector<2x1x32xf32>
    %402 = vector.shape_cast %159 : vector<2x32xf32> to vector<2x1x32xf32>
    %403 = vector.shape_cast %205 : vector<2x32xf32> to vector<2x1x32xf32>
    %404 = vector.shape_cast %251 : vector<2x32xf32> to vector<2x1x32xf32>
    %405 = vector.shape_cast %297 : vector<2x32xf32> to vector<2x1x32xf32>
    %406 = vector.shape_cast %343 : vector<2x32xf32> to vector<2x1x32xf32>
    %407 = vector.shape_cast %389 : vector<2x32xf32> to vector<2x1x32xf32>
    %408 = tpu.concatenate %400, %401, %402, %403, %404, %405, %406, %407 in 1 : vector<2x1x32xf32>, vector<2x1x32xf32>, vector<2x1x32xf32>, vector<2x1x32xf32>, vector<2x1x32xf32>, vector<2x1x32xf32>, vector<2x1x32xf32>, vector<2x1x32xf32> -> vector<2x8x32xf32>
    %c0_70 = arith.constant 0 : index
    %c0_71 = arith.constant 0 : index
    %c0_72 = arith.constant 0 : index
    %409 = vector.load %arg9[%c0_70, %c0_71, %c0_72] : memref<2x8x32xf32, #tpu.memory_space<vmem>>, vector<2x8x32xf32>
    tpu.vector_store %arg9[%c0_70, %c0_71, %c0_72], %408 {strides = array<i32>} : memref<2x8x32xf32, #tpu.memory_space<vmem>>, vector<2x8x32xf32>,
    %410 = vector.shape_cast %47 : vector<2x4xf32> to vector<2x1x4xf32>
    %411 = vector.shape_cast %93 : vector<2x4xf32> to vector<2x1x4xf32>
    %412 = vector.shape_cast %139 : vector<2x4xf32> to vector<2x1x4xf32>
    %413 = vector.shape_cast %185 : vector<2x4xf32> to vector<2x1x4xf32>
    %414 = vector.shape_cast %231 : vector<2x4xf32> to vector<2x1x4xf32>
    %415 = vector.shape_cast %277 : vector<2x4xf32> to vector<2x1x4xf32>
    %416 = vector.shape_cast %323 : vector<2x4xf32> to vector<2x1x4xf32>
    %417 = vector.shape_cast %369 : vector<2x4xf32> to vector<2x1x4xf32>
    %418 = tpu.concatenate %410, %411, %412, %413, %414, %415, %416, %417 in 1 : vector<2x1x4xf32>, vector<2x1x4xf32>, vector<2x1x4xf32>, vector<2x1x4xf32>, vector<2x1x4xf32>, vector<2x1x4xf32>, vector<2x1x4xf32>, vector<2x1x4xf32> -> vector<2x8x4xf32>
    %c0_73 = arith.constant 0 : index
    %c0_74 = arith.constant 0 : index
    %c0_75 = arith.constant 0 : index
    %419 = vector.load %arg10[%c0_73, %c0_74, %c0_75] : memref<2x8x4xf32, #tpu.memory_space<vmem>>, vector<2x8x4xf32>
    tpu.vector_store %arg10[%c0_73, %c0_74, %c0_75], %418 {strides = array<i32>} : memref<2x8x4xf32, #tpu.memory_space<vmem>>, vector<2x8x4xf32>,
    return
  }
}

</mosaic_0001>

<bundles_post_ra>
// kernel: encoder_ankle_forward.1
= control target key start
LH: loop header
LB: loop body
LE: loop exit
PB: predicated region body
PF: predicated region fallthrough
CT: control target
= control target key end

     0   :  { %s5192_s0 = inlined_call_operand.vmem [shape: f32[2,8,4], index: 0, kind: input, shape index: {}]   ;;  %s5193_s1 = inlined_call_operand.vmem [shape: f32[8,8], index: 1, kind: input, shape index: {}]   ;;  %s5194_s2 = inlined_call_operand.vmem [shape: f32[64,8], index: 2, kind: input, shape index: {}]   ;;  %s5195_s3 = inlined_call_operand.vmem [shape: f32[1,8], index: 3, kind: input, shape index: {}]   ;;  %s5196_s4 = inlined_call_operand.vmem [shape: f32[1,8], index: 4, kind: input, shape index: {}]   ;;  %s5197_s5 = inlined_call_operand.<no memory space> [shape: f32[1,1], index: 5, kind: input, shape index: {}]   ;;  %s5198_s6 = inlined_call_operand.vmem [shape: f32[36,128], index: 6, kind: input, shape index: {}]   ;;  %s5199_s7 = inlined_call_operand.vmem [shape: f32[1,128], index: 7, kind: input, shape index: {}]   ;;  %s5200_s8 = inlined_call_operand.vmem [shape: f32[2,8,4], index: 8, kind: output, shape index: {0}]   ;;  %s5201_s9 = inlined_call_operand.hbm [shape: f32[2,8,32], index: 9, kind: output, shape index: {1}]   ;;  %s5202_s10 = inlined_call_operand.vmem [shape: f32[2,8,4], index: 10, kind: output, shape index: {2}]  }
   0x1   :  { %v16_v0 = vstv %s5197_s5 }
   0x2   :  { %17 = vst [vmem:[#allocation2] sm:$0x1] %v16_v0 }
   0x3   :  { %v4257_v1 = vld [vmem:[%s5192_s0] sm:$0xff]  ;;  %v4185_v3 = vmov 0.0  }
   0x4   :  { %v37_v2 = vld [vmem:[%s5193_s1] sm:$0xff]  ;;  %55 = vxpose.xlu0.b32.start.end [1/1] (short) (narrow) %v4257_v1, 8  ;;  %3588 = vmatprep.subr.mxu0 %v4185_v3 }
   0x5   :  { %18 = vsyncpa [#allocation4], 0  ;;  %v4267_v4 = vld [vmem:[%s5192_s0 + $0x8] sm:$0xff]  ;;  %3589 = vmatpush3.msra.mxu0 %v37_v2  ;;  %vm4186_vm0 = vmmov 0   ;;  %v4187_v5 = vmov 0.0|0.0   ;;  %3593 = vmatprep.subr.mxu1 %v4185_v3  ;;  %v38_v6 = vld [vmem:[%s5194_s2] sm:$0xff]  ;;  %v350_v28 = vlaneseq }
   0x6   :  { %3590 = vmatprep.mubr.msk.f32.mxu0 %vm4186_vm0, %v4185_v3  ;;  %3854 = vmatprep.subr.bf16.mxu0 %v4187_v5  ;;  %v39_v7 = vld [vmem:[%s5194_s2 + $0x8] sm:$0xff]  ;;  %vm87_vm1 = vcmask 64512   ;;  %v40_v9 = vld [vmem:[%s5194_s2 + $0x10] sm:$0xff]  ;;  %v41_v10 = vld [vmem:[%s5194_s2 + $0x18] sm:$0xff]  ;;  %v4188_v21 = vmov 0   ;;  %vm391_vm2 = vcmask 60416  }
   0x7   :  { %3594 = vmatpush3.msra.mxu1 %v37_v2  ;;  %3595 = vmatprep.mubr.msk.f32.mxu1 %vm4186_vm0, %v4185_v3  ;;  %v4283_v8 = vpack.c.bf16 %v39_v7, %v38_v6  ;;  %v4292_v12 = vpack.c.bf16 %v41_v10, %v40_v9  ;;  %v42_v13 = vld [vmem:[%s5194_s2 + $0x20] sm:$0xff]  ;;  %v43_v14 = vld [vmem:[%s5194_s2 + $0x28] sm:$0xff]  ;;  %v44_v17 = vld [vmem:[%s5194_s2 + $0x30] sm:$0xff]  ;;  %v4189_v26 = vmov 1966171168   ;;  %v4328_v30 = vshrl.u32 %v350_v28, 7 }
   0x8   :  { %161 = vxpose.xlu0.b32.start.end [1/1] (short) (narrow) %v4267_v4, 8  ;;  %3866 = vmatprep.subr.bf16.mxu1 %v4187_v5  ;;  %v4304_v16 = vpack.c.bf16 %v43_v14, %v42_v13  ;;  %v45_v18 = vld [vmem:[%s5194_s2 + $0x38] sm:$0xff]  ;;  %v348_v27 = vunpack.c.l.s4 %v4189_v26  ;;  %v4333_v31 = vld [vmem:[%s5195_s3] ss:$0 sm:$0xff]  ;;  %v412_v52 = vand.u32 127, %v350_v28  ;;  %vm421_vm3 = vcmask 1041409  }
   0x9   :  { %v4316_v19 = vpack.c.bf16 %v45_v18, %v44_v17  ;;  %v3431_v20 = vld [vmem:[#allocation2] ss:$0 sm:$0xff]  ;;  %4010 = vset.pattern.permute.xlu1 %v4188_v21  ;;  %v4341_v37 = vsub.s32 0, %v4328_v30  ;;  %vm424_vm4 = vcmask 25600   ;;  %v4370_v63 = vsub.s32 1, %v4328_v30  ;;  %v50_v28 = vld [vmem:[%s5198_s6 + $0x8] sm:$0xff] }
   0xa   :  { %v349_v29 = vunpack.c.0.s8 %v348_v27  ;;  %v4352_v45 = vld [vmem:[%s5196_s4] ss:$0 sm:$0xff]  ;;  %v4361_v55 = vsub.s32 %v412_v52, %v4328_v30  ;;  %vm530_vm5 = vcmask 1043456   ;;  %vm518_vm6 = vcmask 31744   ;;  %s4190_s28 = smov 32   ;;  %s4191_s29 = smov 64  }
   0xb   :  { %v492_v17 = vrot.slane %v4267_v4, %v4341_v37  ;;  %v49_v27 = vld [vmem:[%s5198_s6] sm:$0xff]  ;;  %vm526_vm7 = vcmask 293888   ;;  %vm632_vm8 = vcmask 261120   ;;  %vm272_vm9 = vcmask 523264   ;;  %s4192_s30 = smov 68   ;;  %s4193_s22 = smov [#allocation3]  }
   0xc   :  { %v4336_v32 = vsub.s32 %v349_v29, %v4328_v30  ;;  %v4388_v29 = vpack.c.bf16 %v50_v28, %v49_v27  ;;  %vm3076_vm10 = vcmask 1040384   ;;  %vm3079_vm11 = vcmask 1041408   ;;  %s3410_s23 = sshll.u32 %s4193_s22, 4  ;;  %s3411_s23 = int_to_ptr.vmem [resolvable:$true] %s3410_s23 }
   0xd   :  { %vm3082_vm12 = vcmask 1042432   ;;  %vm3087_vm13 = vcmask 1044480   ;;  %vm3090_vm14 = vcmask 1045504   ;;  %vm3093_vm15 = vcmask 1046528   ;;  %s4161_s24 = scalar_lea.vmem %s3411_s23, 256  ;;  %p4166_p1 = scmp.lt.s32.totalorder %s3411_s23, %s3411_s23 }
   0xe   :  { %p4162_p0 = scmp.ne.s32.totalorder %s3411_s23, %s4161_s24  ;;  %p4167_p2 = scmp.lt.s32.totalorder %s4161_s24, %s4161_s24 }
  0x10   :  { %p4168_p3 = por %p4167_p2, %p4166_p1 }
  0x12   :  { %p4169_p4 = pnand %p4168_p3, %p4162_p0 }
  0x31   :  { %4009 = vset.pattern.permute.xlu0 %v4188_v21 }
  0x32   :  { %404 = vperm.xlu0 %4009, %v3431_v20  }
  0x84   :  { %v71_v11 = vpop.trf.xlu0 }
  0x85   :  { %3591 = vmatmul.mubr.msk.f32.vlgmr.msra.gmra.mrb[0].mxu0 %vm87_vm1, %v71_v11 }
  0x86   :  { %3856 = vmatpush3.bf16.msra.mxu0 %v4283_v8  ;;  %3614 = vmatprep.mubr.msk.f32.mxu0 %vm4186_vm0, %v4185_v3 }
  0x87   :  { %3857 = vmatprep.subr.bf16.mxu0 %v4187_v5 }
  0x88   :  { %v177_v15 = vpop.trf.xlu0 }
  0x89   :  { %3596 = vmatmul.mubr.msk.f32.vlgmr.msra.gmra.mrb[0].mxu1 %vm87_vm1, %v177_v15  ;;  %v485_v15 = vrot.slane %v4257_v1, %v4341_v37 }
  0x8a   :  { %3859 = vmatpush3.bf16.msra.mxu0 %v4292_v12  ;;  %3627 = vmatprep.mubr.msk.f32.mxu1 %vm4186_vm0, %v4185_v3 }
  0x8b   :  { %3860 = vmatprep.subr.bf16.mxu0 %v4187_v5  ;;  %487 = vbcast.lane.b32.xlu0 %v485_v15, 256 }
  0x8c   :  { %3868 = vmatpush3.bf16.msra.mxu1 %v4388_v29 }
  0x8d   :  { %3869 = vmatprep.subr.bf16.mxu1 %v4187_v5 }
  0x8e   :  { %3862 = vmatpush3.bf16.msra.mxu0 %v4304_v16 }
  0x8f   :  { %3863 = vmatprep.subr.bf16.mxu0 %v4187_v5  ;;  %494 = vbcast.lane.b32.xlu0 %v492_v17, 256 }
  0x92   :  { %3865 = vmatpush3.bf16.msra.mxu0 %v4316_v19 }
  0x93   :  { %3884 = vmatprep.subr.bf16.mxu0 %v4187_v5 }
  0x95   :  { %3615 = vmatmul.mubr.f32.vlgmr.msra.gmra.mrb[2].mxu0 %v4185_v3 }
  0x96   :  { %3659 = vmatprep.mubr.msk.f32.mxu0 %vm4186_vm0, %v4185_v3  ;;  %3886 = vmatpush3.bf16.msra.mxu0 %v4388_v29 }
  0x97   :  { %3887 = vmatprep.subr.bf16.mxu0 %v4187_v5 }
  0xb1   :  { %v4358_v54 = vpop.permute.xlu0 %404 }
 0x158   :  { %v4324_v22 = vpop.f32.mrb[0].mxu0 }
 0x159   :  { %v3592_v23 = vpop.f32.mrb[1].mxu0 }
 0x15c   :  { %v4326_v24 = vpop.f32.mrb[0].mxu1 }
 0x15d   :  { %v3597_v25 = vpop.f32.mrb[1].mxu1 }
 0x168   :  { %v342_v33 = vpop.f32.mrb[2].mxu0 }
 0x169   :  { %v343_v34 = vadd.f32 %v4333_v31, %v342_v33  ;;  %v3616_v35 = vpop.f32.mrb[3].mxu0 }
 0x16a   :  { %v488_v35 = vpop.permute.xlu0 %487 }
 0x16b   :  { %v353_v36 = vrot.slane %v343_v34, %v4336_v32 }
 0x16d   :  { %v354_v38 = vcombine.high %v353_v36, %v353_v36  ;;  %v361_v39 = vrot.slane %v353_v36, %v4336_v32 }
 0x16f   :  { %v368_v40 = vrot.slane %v354_v38, %v4336_v32  ;;  %v372_v41 = vrot.slane %v361_v39, %v4341_v37 }
 0x171   :  { %v376_v42 = vrot.slane %v368_v40, %v4341_v37  ;;  %v379_v43 = vadd.f32 %v372_v41, %v4324_v22 }
 0x173   :  { %4011 = vtanh.f32 %v379_v43  ;;  %v380_v44 = vadd.f32 %v376_v42, %v4326_v24  ;;  %v495_v42 = vpop.permute.xlu0 %494  ;;  %v51_v43 = vld [vmem:[%s5198_s6 + $0x10] sm:$0xff] }
 0x175   :  { %4013 = vtanh.f32 %v380_v44  ;;  %v52_v44 = vld [vmem:[%s5198_s6 + $0x18] sm:$0xff] }
 0x17d   :  { %v4012_v46 = vpop.eup %4011 }
 0x17e   :  { %v389_v47 = vmul.f32 %v4012_v46, %v4352_v45  ;;  %v4407_v46 = vpack.c.bf16 %v52_v44, %v51_v43 }
 0x17f   :  { %v4014_v48 = vpop.eup %4013 }
 0x180   :  { %v392_v49 = vsel %vm391_vm2, %v389_v47, 0.0  ;;  %v390_v50 = vmul.f32 %v4014_v48, %v4352_v45  ;;  %3871 = vmatpush3.bf16.msra.mxu1 %v4407_v46  ;;  %3889 = vmatpush3.bf16.msra.mxu0 %v4407_v46  ;;  %v4417_v48 = vld [vmem:[%s5198_s6 + $0x20] sm:$0xf] }
 0x181   :  { %393 = vadd.xlane.f32.xlu1 %v392_v49  ;;  %3625 = vmatprep.subr.mxu1 %v4185_v3 }
 0x182   :  { %v395_v51 = vsel %vm391_vm2, %v390_v50, 0.0  ;;  %3657 = vmatprep.subr.mxu0 %v4185_v3 }
 0x184   :  { %3626 = vmatpush3.msk.msra.mxu1 %vm530_vm5, %v4417_v48  ;;  %3658 = vmatpush3.msk.msra.mxu0 %vm530_vm5, %v4417_v48 }
 0x185   :  { %396 = vadd.xlane.f32.xlu1 %v395_v51  ;;  %3872 = vmatprep.subr.bf16.mxu1 %v4187_v5 }
 0x186   :  { %3890 = vmatprep.subr.bf16.mxu0 %v4187_v5 }
 0x20e   :  { %v394_v53 = vpop.xlane.xlu1 %393 }
 0x20f   :  { %v407_v56 = vadd.f32 %v4358_v54, %v394_v53 }
 0x211   :  { %v416_v60 = vrot.slane %v407_v56, %v4361_v55 }
 0x212   :  { %v397_v57 = vpop.xlane.xlu1 %396 }
 0x213   :  { %v408_v58 = vadd.f32 %v4358_v54, %v397_v57  ;;  %v4449_v57 = vld [vmem:[%s5199_s7] ss:$0 sm:$0xff] }
 0x215   :  { %v420_v59 = vrot.slane %v408_v58, %v4361_v55 }
 0x217   :  { %v422_v61 = vsel %vm421_vm3, %v420_v59, %v416_v60 }
 0x218   :  { %v425_v62 = vsel %vm424_vm4, %v422_v61, -inf }
 0x219   :  { %426 = vmax.xlane.f32.xlu1 %v425_v62 }
 0x2a6   :  { %v427_v0 = vpop.xlane.xlu1 %426 }
 0x2a7   :  { %v432_v2 = vrot.slane %v427_v0, %v4341_v37  ;;  %v436_v6 = vrot.slane %v427_v0, %v4370_v63 }
 0x2a9   :  { %v439_v7 = vsub.f32 %v407_v56, %v432_v2  ;;  %v440_v9 = vsub.f32 %v408_v58, %v436_v6 }
 0x2ab   :  { %v441_v10 = vmul.f32 1.442695, %v439_v7  ;;  %v443_v11 = vmul.f32 1.442695, %v440_v9 }
 0x2ad   :  { %4015 = vpow2.f32 %v441_v10 }
 0x2ae   :  { %4017 = vpow2.f32 %v443_v11 }
 0x2b7   :  { %v4016_v13 = vpop.eup %4015 }
 0x2b8   :  { %448 = vperm.xlu1 %4010, %v4016_v13   ;;  %v4018_v14 = vpop.eup %4017 }
 0x2bc   :  { %451 = vperm.xlu1 %4010, %v4018_v14  }
 0x337   :  { %v449_v18 = vpop.permute.xlu1 %448 }
 0x338   :  { %v456_v21 = vrot.slane %v449_v18, %v4361_v55 }
 0x33b   :  { %v452_v20 = vpop.permute.xlu1 %451 }
 0x33c   :  { %v460_v23 = vrot.slane %v452_v20, %v4361_v55 }
 0x33e   :  { %v461_v25 = vsel %vm421_vm3, %v460_v23, %v456_v21 }
 0x33f   :  { %v463_v26 = vsel %vm424_vm4, %v461_v25, 0.0 }
 0x340   :  { %464 = vadd.xlane.f32.xlu1 %v463_v26 }
 0x3cd   :  { %v465_v33 = vpop.xlane.xlu1 %464 }
 0x3ce   :  { %4019 = vrcp.f32 %v465_v33 }
 0x3d8   :  { %v4020_v34 = vpop.eup %4019 }
 0x3d9   :  { %v471_v36 = vrot.slane %v4020_v34, %v4341_v37  ;;  %v475_v38 = vrot.slane %v4020_v34, %v4370_v63 }
 0x3db   :  { %v4396_v39 = vmul.f32 %v4016_v13, %v471_v36  ;;  %v4399_v41 = vmul.f32 %v4018_v14, %v475_v38 }
 0x3dd   :  { %v498_v40 = vmul.f32 %v488_v35, %v4396_v39  ;;  %v499_v47 = vmul.f32 %v495_v42, %v4399_v41 }
 0x3df   :  { %503 = vperm.xlu0 %4009, %v498_v40  }
 0x3e3   :  { %506 = vperm.xlu0 %4009, %v499_v47  }
 0x45e   :  { %v504_v49 = vpop.permute.xlu0 %503 }
 0x45f   :  { %v4426_v51 = vrot.slane %v504_v49, %v4361_v55 }
 0x462   :  { %v507_v50 = vpop.permute.xlu0 %506 }
 0x463   :  { %v4429_v52 = vrot.slane %v507_v50, %v4361_v55 }
 0x465   :  { %v516_v53 = vsel %vm421_vm3, %v4429_v52, %v4426_v51 }
 0x466   :  { %v519_v56 = vsel %vm518_vm6, %v516_v53, 0.0 }
 0x467   :  { %3628 = vmatmul.mubr.msk.f32.vlgmr.msra.gmra.mrb[2].mxu1 %vm526_vm7, %v519_v56 }
 0x468   :  { %3874 = vmatpush3.bf16.msra.mxu1 %v4283_v8  ;;  %3646 = vmatprep.mubr.msk.f32.mxu1 %vm4186_vm0, %v4185_v3 }
 0x469   :  { %3875 = vmatprep.subr.bf16.mxu1 %v4187_v5 }
 0x46c   :  { %3877 = vmatpush3.bf16.msra.mxu1 %v4292_v12 }
 0x46d   :  { %3878 = vmatprep.subr.bf16.mxu1 %v4187_v5 }
 0x470   :  { %3880 = vmatpush3.bf16.msra.mxu1 %v4304_v16 }
 0x471   :  { %3881 = vmatprep.subr.bf16.mxu1 %v4187_v5 }
 0x474   :  { %3883 = vmatpush3.bf16.msra.mxu1 %v4316_v19 }
 0x475   :  { %3902 = vmatprep.subr.bf16.mxu1 %v4187_v5 }
 0x53a   :  { %v600_v58 = vpop.f32.mrb[2].mxu1 }
 0x53b   :  { %v601_v59 = vadd.f32 %v4449_v57, %v600_v58  ;;  %v3629_v60 = vpop.f32.mrb[3].mxu1 }
 0x53d   :  { %4021 = vtanh.f32 %v601_v59  ;;  %v3435_v62 = vmul.f32 -1.442695, %v601_v59 }
 0x53f   :  { %4023 = vpow2.f32 %v3435_v62 }
 0x547   :  { %v4022_v61 = vpop.eup %4021 }
 0x548   :  { %613 = vrot.lane.b32.xlu0 %v4022_v61, %s4190_s28 }
 0x549   :  { %v4024_v0 = vpop.eup %4023 }
 0x54a   :  { %v607_v2 = vadd.f32 1.0, %v4024_v0 }
 0x54c   :  { %4025 = vrcp.f32 %v607_v2 }
 0x556   :  { %v4026_v6 = vpop.eup %4025 }
 0x557   :  { %v611_v10 = vmul.f32 0.0, %v4026_v6 }
 0x5ba   :  { %v614_v7 = vpop.permute.xlu0 %613 }
 0x5bb   :  { %v616_v9 = vmul.f32 %v4026_v6, %v614_v7 }
 0x5bd   :  { %618 = vrot.lane.b32.xlu0 %v616_v9, %s4190_s28 }
 0x62f   :  { %v619_v11 = vpop.permute.xlu0 %618 }
 0x630   :  { %v4454_v13 = vadd.f32 %v619_v11, %v611_v10 }
 0x632   :  { %4027 = vtanh.f32 %v4454_v13 }
 0x63c   :  { %v4028_v14 = vpop.eup %4027 }
 0x63d   :  { %624 = vrot.lane.b32.xlu1 %v4028_v14, %s4190_s28 }
 0x6af   :  { %v625_v15 = vpop.permute.xlu1 %624 }
 0x6b0   :  { %v4458_v17 = vmul.f32 %v4026_v6, %v625_v15 }
 0x6b2   :  { %629 = vrot.lane.b32.xlu0 %v4458_v17, %s4191_s29 }
 0x724   :  { %v630_v18 = vpop.permute.xlu0 %629 }
 0x725   :  { %v633_v20 = vsel %vm632_vm8, %v630_v18, %v4454_v13  ;;  %v824_v18 = vrot.slane %v4257_v1, %v4370_v63 }
 0x726   :  { %3647 = vmatmul.mubr.msk.f32.vlgmr.msra.gmra.mrb[4].mxu1 %vm272_vm9, %v633_v20  ;;  %v831_v20 = vrot.slane %v4267_v4, %v4370_v63 }
 0x727   :  { %3904 = vmatpush3.bf16.msra.mxu1 %v4388_v29  ;;  %3691 = vmatprep.mubr.msk.f32.mxu1 %vm4186_vm0, %v4185_v3 }
 0x728   :  { %3905 = vmatprep.subr.bf16.mxu1 %v4187_v5 }
 0x72b   :  { %3907 = vmatpush3.bf16.msra.mxu1 %v4407_v46 }
 0x72c   :  { %3689 = vmatprep.subr.mxu1 %v4185_v3 }
 0x72f   :  { %3690 = vmatpush3.msk.msra.mxu1 %vm530_vm5, %v4417_v48 }
 0x730   :  { %3908 = vmatprep.subr.bf16.mxu1 %v4187_v5 }
 0x7f9   :  { %v703_v21 = vpop.f32.mrb[4].mxu1 }
 0x7fa   :  { %v704_v23 = vadd.f32 %v4333_v31, %v703_v21  ;;  %v3648_v25 = vpop.f32.mrb[5].mxu1 }
 0x7fc   :  { %v714_v26 = vrot.slane %v704_v23, %v4336_v32 }
 0x7fe   :  { %v715_v27 = vcombine.high %v714_v26, %v714_v26  ;;  %v722_v28 = vrot.slane %v714_v26, %v4336_v32 }
 0x800   :  { %v729_v33 = vrot.slane %v715_v27, %v4336_v32  ;;  %v733_v34 = vrot.slane %v722_v28, %v4341_v37 }
 0x802   :  { %v737_v35 = vrot.slane %v729_v33, %v4341_v37  ;;  %v740_v36 = vadd.f32 %v733_v34, %v4324_v22 }
 0x804   :  { %v741_v38 = vadd.f32 %v737_v35, %v4326_v24  ;;  %4029 = vtanh.f32 %v740_v36 }
 0x806   :  { %4031 = vtanh.f32 %v741_v38 }
 0x80e   :  { %v4030_v40 = vpop.eup %4029 }
 0x80f   :  { %v744_v42 = vmul.f32 %v4030_v40, %v4352_v45 }
 0x810   :  { %v4032_v43 = vpop.eup %4031 }
 0x811   :  { %v746_v44 = vsel %vm391_vm2, %v744_v42, 0.0  ;;  %v745_v47 = vmul.f32 %v4032_v43, %v4352_v45 }
 0x812   :  { %747 = vadd.xlane.f32.xlu0 %v746_v44 }
 0x813   :  { %v749_v49 = vsel %vm391_vm2, %v745_v47, 0.0 }
 0x814   :  { %750 = vadd.xlane.f32.xlu1 %v749_v49 }
 0x89f   :  { %v748_v50 = vpop.xlane.xlu0 %747 }
 0x8a0   :  { %v752_v53 = vadd.f32 %v748_v50, %v4358_v54 }
 0x8a1   :  { %v751_v56 = vpop.xlane.xlu1 %750 }
 0x8a2   :  { %v753_v58 = vadd.f32 %v751_v56, %v4358_v54  ;;  %v759_v59 = vrot.slane %v752_v53, %v4361_v55 }
 0x8a4   :  { %v763_v60 = vrot.slane %v753_v58, %v4361_v55 }
 0x8a6   :  { %v764_v61 = vsel %vm421_vm3, %v763_v60, %v759_v59 }
 0x8a7   :  { %v766_v62 = vsel %vm424_vm4, %v764_v61, -inf }
 0x8a8   :  { %767 = vmax.xlane.f32.xlu0 %v766_v62 }
 0x935   :  { %v768_v0 = vpop.xlane.xlu0 %767 }
 0x936   :  { %v773_v2 = vrot.slane %v768_v0, %v4341_v37  ;;  %v777_v6 = vrot.slane %v768_v0, %v4370_v63 }
 0x938   :  { %v780_v7 = vsub.f32 %v752_v53, %v773_v2  ;;  %v781_v9 = vsub.f32 %v753_v58, %v777_v6 }
 0x93a   :  { %v782_v10 = vmul.f32 1.442695, %v780_v7  ;;  %v784_v11 = vmul.f32 1.442695, %v781_v9 }
 0x93c   :  { %4033 = vpow2.f32 %v782_v10 }
 0x93d   :  { %4035 = vpow2.f32 %v784_v11 }
 0x946   :  { %v4034_v14 = vpop.eup %4033 }
 0x947   :  { %v4036_v15 = vpop.eup %4035  ;;  %789 = vperm.xlu0 %4009, %v4034_v14  }
 0x948   :  { %792 = vperm.xlu1 %4010, %v4036_v15  }
 0x94c   :  { %826 = vbcast.lane.b32.xlu1 %v824_v18, 256 }
 0x950   :  { %833 = vbcast.lane.b32.xlu1 %v831_v20, 256 }
 0x9c6   :  { %v790_v21 = vpop.permute.xlu0 %789 }
 0x9c7   :  { %v793_v23 = vpop.permute.xlu1 %792  ;;  %v797_v25 = vrot.slane %v790_v21, %v4361_v55 }
 0x9c8   :  { %v801_v26 = vrot.slane %v793_v23, %v4361_v55 }
 0x9ca   :  { %v802_v27 = vsel %vm421_vm3, %v801_v26, %v797_v25 }
 0x9cb   :  { %v804_v28 = vsel %vm424_vm4, %v802_v27, 0.0  ;;  %v827_v35 = vpop.permute.xlu1 %826 }
 0x9cc   :  { %805 = vadd.xlane.f32.xlu0 %v804_v28 }
 0x9cf   :  { %v834_v44 = vpop.permute.xlu1 %833 }
 0xa59   :  { %v806_v33 = vpop.xlane.xlu0 %805 }
 0xa5a   :  { %4037 = vrcp.f32 %v806_v33 }
 0xa64   :  { %v4038_v34 = vpop.eup %4037 }
 0xa65   :  { %v812_v36 = vrot.slane %v4038_v34, %v4341_v37  ;;  %v816_v38 = vrot.slane %v4038_v34, %v4370_v63 }
 0xa67   :  { %v4504_v40 = vmul.f32 %v4034_v14, %v812_v36  ;;  %v4507_v43 = vmul.f32 %v4036_v15, %v816_v38 }
 0xa69   :  { %v837_v42 = vmul.f32 %v827_v35, %v4504_v40  ;;  %v838_v47 = vmul.f32 %v834_v44, %v4507_v43 }
 0xa6b   :  { %842 = vperm.xlu1 %4010, %v837_v42  }
 0xa6f   :  { %845 = vperm.xlu1 %4010, %v838_v47  }
 0xa73   :  { %857 = vrot.lane.b32.xlu1 %v4458_v17, %s4192_s30 }
 0xaea   :  { %v843_v49 = vpop.permute.xlu1 %842 }
 0xaeb   :  { %v4513_v53 = vrot.slane %v843_v49, %v4361_v55 }
 0xaee   :  { %v846_v50 = vpop.permute.xlu1 %845 }
 0xaef   :  { %v4516_v56 = vrot.slane %v846_v50, %v4361_v55 }
 0xaf1   :  { %v855_v58 = vsel %vm421_vm3, %v4516_v56, %v4513_v53 }
 0xaf2   :  { %v858_v59 = vpop.permute.xlu1 %857 }
 0xaf3   :  { %v860_v60 = vsel %vm518_vm6, %v855_v58, %v858_v59 }
 0xaf4   :  { %3660 = vmatmul.mubr.msk.f32.vlgmr.msra.gmra.mrb[4].mxu0 %vm526_vm7, %v860_v60 }
 0xaf5   :  { %3892 = vmatpush3.bf16.msra.mxu0 %v4283_v8  ;;  %3678 = vmatprep.mubr.msk.f32.mxu0 %vm4186_vm0, %v4185_v3 }
 0xaf6   :  { %3893 = vmatprep.subr.bf16.mxu0 %v4187_v5 }
 0xaf9   :  { %3895 = vmatpush3.bf16.msra.mxu0 %v4292_v12 }
 0xafa   :  { %3896 = vmatprep.subr.bf16.mxu0 %v4187_v5 }
 0xafd   :  { %3898 = vmatpush3.bf16.msra.mxu0 %v4304_v16 }
 0xafe   :  { %3899 = vmatprep.subr.bf16.mxu0 %v4187_v5 }
 0xb01   :  { %3901 = vmatpush3.bf16.msra.mxu0 %v4316_v19 }
 0xb02   :  { %3920 = vmatprep.subr.bf16.mxu0 %v4187_v5 }
 0xbc7   :  { %v930_v61 = vpop.f32.mrb[4].mxu0 }
 0xbc8   :  { %v931_v62 = vadd.f32 %v4449_v57, %v930_v61  ;;  %v3661_v0 = vpop.f32.mrb[5].mxu0 }
 0xbca   :  { %4039 = vtanh.f32 %v931_v62  ;;  %v3439_v6 = vmul.f32 -1.442695, %v931_v62 }
 0xbcc   :  { %4041 = vpow2.f32 %v3439_v6 }
 0xbd4   :  { %v4040_v2 = vpop.eup %4039 }
 0xbd5   :  { %943 = vrot.lane.b32.xlu1 %v4040_v2, %s4190_s28 }
 0xbd6   :  { %v4042_v7 = vpop.eup %4041 }
 0xbd7   :  { %v937_v9 = vadd.f32 1.0, %v4042_v7 }
 0xbd9   :  { %4043 = vrcp.f32 %v937_v9 }
 0xbe3   :  { %v4044_v10 = vpop.eup %4043 }
 0xbe4   :  { %v941_v15 = vmul.f32 %v4044_v10, %v4454_v13 }
 0xc47   :  { %v944_v11 = vpop.permute.xlu1 %943 }
 0xc48   :  { %v946_v14 = vmul.f32 %v4044_v10, %v944_v11 }
 0xc4a   :  { %948 = vrot.lane.b32.xlu1 %v946_v14, %s4190_s28 }
 0xcbc   :  { %v949_v18 = vpop.permute.xlu1 %948 }
 0xcbd   :  { %v4537_v20 = vadd.f32 %v949_v18, %v941_v15 }
 0xcbf   :  { %4045 = vtanh.f32 %v4537_v20 }
 0xcc9   :  { %v4046_v21 = vpop.eup %4045 }
 0xcca   :  { %954 = vrot.lane.b32.xlu0 %v4046_v21, %s4190_s28 }
 0xd3c   :  { %v955_v23 = vpop.permute.xlu0 %954 }
 0xd3d   :  { %v4541_v25 = vmul.f32 %v4044_v10, %v955_v23 }
 0xd3f   :  { %959 = vrot.lane.b32.xlu1 %v4541_v25, %s4191_s29 }
 0xdb1   :  { %v960_v26 = vpop.permute.xlu1 %959 }
 0xdb2   :  { %v962_v27 = vsel %vm632_vm8, %v960_v26, %v4537_v20 }
 0xdb3   :  { %3679 = vmatmul.mubr.msk.f32.vlgmr.msra.gmra.mrb[6].mxu0 %vm272_vm9, %v962_v27 }
 0xdb4   :  { %3922 = vmatpush3.bf16.msra.mxu0 %v4388_v29  ;;  %3723 = vmatprep.mubr.msk.f32.mxu0 %vm4186_vm0, %v4185_v3 }
 0xdb5   :  { %3923 = vmatprep.subr.bf16.mxu0 %v4187_v5 }
 0xdb8   :  { %3925 = vmatpush3.bf16.msra.mxu0 %v4407_v46 }
 0xdb9   :  { %3721 = vmatprep.subr.mxu0 %v4185_v3 }
 0xdbc   :  { %3722 = vmatpush3.msk.msra.mxu0 %vm530_vm5, %v4417_v48 }
 0xdbd   :  { %3926 = vmatprep.subr.bf16.mxu0 %v4187_v5 }
 0xe86   :  { %v1032_v13 = vpop.f32.mrb[6].mxu0 }
 0xe87   :  { %v1033_v28 = vadd.f32 %v4333_v31, %v1032_v13  ;;  %v3680_v33 = vpop.f32.mrb[7].mxu0 }
 0xe89   :  { %v1043_v34 = vrot.slane %v1033_v28, %v4336_v32 }
 0xe8b   :  { %v1044_v35 = vcombine.high %v1043_v34, %v1043_v34  ;;  %v1051_v36 = vrot.slane %v1043_v34, %v4336_v32  ;;  %v1152_v34 = vsub.s32 2, %v4328_v30 }
 0xe8d   :  { %v1058_v38 = vrot.slane %v1044_v35, %v4336_v32  ;;  %v1062_v42 = vrot.slane %v1051_v36, %v4341_v37  ;;  %v1153_v35 = vrot.slane %v4257_v1, %v1152_v34  ;;  %v1160_v36 = vrot.slane %v4267_v4, %v1152_v34 }
 0xe8f   :  { %v1066_v44 = vrot.slane %v1058_v38, %v4341_v37  ;;  %v1069_v47 = vadd.f32 %v1062_v42, %v4324_v22 }
 0xe91   :  { %v1070_v49 = vadd.f32 %v1066_v44, %v4326_v24  ;;  %4047 = vtanh.f32 %v1069_v47 }
 0xe93   :  { %4049 = vtanh.f32 %v1070_v49 }
 0xe9b   :  { %v4048_v50 = vpop.eup %4047 }
 0xe9c   :  { %v1073_v58 = vmul.f32 %v4048_v50, %v4352_v45 }
 0xe9d   :  { %v4050_v59 = vpop.eup %4049 }
 0xe9e   :  { %v1075_v60 = vsel %vm391_vm2, %v1073_v58, 0.0  ;;  %v1074_v61 = vmul.f32 %v4050_v59, %v4352_v45 }
 0xe9f   :  { %1076 = vadd.xlane.f32.xlu1 %v1075_v60 }
 0xea0   :  { %v1078_v62 = vsel %vm391_vm2, %v1074_v61, 0.0 }
 0xea1   :  { %1079 = vadd.xlane.f32.xlu0 %v1078_v62 }
 0xf2c   :  { %v1077_v0 = vpop.xlane.xlu1 %1076 }
 0xf2d   :  { %v1081_v2 = vadd.f32 %v1077_v0, %v4358_v54 }
 0xf2e   :  { %v1080_v6 = vpop.xlane.xlu0 %1079 }
 0xf2f   :  { %v1082_v7 = vadd.f32 %v1080_v6, %v4358_v54  ;;  %v1088_v9 = vrot.slane %v1081_v2, %v4361_v55 }
 0xf31   :  { %v1092_v10 = vrot.slane %v1082_v7, %v4361_v55 }
 0xf33   :  { %v1093_v11 = vsel %vm421_vm3, %v1092_v10, %v1088_v9 }
 0xf34   :  { %v1095_v14 = vsel %vm424_vm4, %v1093_v11, -inf }
 0xf35   :  { %1096 = vmax.xlane.f32.xlu1 %v1095_v14  ;;  %v3387_v14 = vsel %vm3076_vm10, %v4426_v51, %v4513_v53 }
 0xfc2   :  { %v1097_v15 = vpop.xlane.xlu1 %1096 }
 0xfc3   :  { %v1102_v18 = vrot.slane %v1097_v15, %v4341_v37  ;;  %v1106_v21 = vrot.slane %v1097_v15, %v4370_v63 }
 0xfc5   :  { %v1109_v23 = vsub.f32 %v1081_v2, %v1102_v18  ;;  %v1110_v26 = vsub.f32 %v1082_v7, %v1106_v21 }
 0xfc7   :  { %v1111_v27 = vmul.f32 1.442695, %v1109_v23  ;;  %v1113_v13 = vmul.f32 1.442695, %v1110_v26  ;;  %v3388_v23 = vsel %vm3076_vm10, %v4429_v52, %v4516_v56 }
 0xfc9   :  { %4051 = vpow2.f32 %v1111_v27 }
 0xfca   :  { %4053 = vpow2.f32 %v1113_v13 }
 0xfd3   :  { %v4052_v28 = vpop.eup %4051 }
 0xfd4   :  { %v4054_v33 = vpop.eup %4053  ;;  %1118 = vperm.xlu1 %4010, %v4052_v28  }
 0xfd5   :  { %1121 = vperm.xlu0 %4009, %v4054_v33  }
 0xfd9   :  { %1155 = vbcast.lane.b32.xlu0 %v1153_v35, 256 }
 0xfdd   :  { %1162 = vbcast.lane.b32.xlu0 %v1160_v36, 256 }
0x1053   :  { %v1119_v38 = vpop.permute.xlu1 %1118 }
0x1054   :  { %v1122_v42 = vpop.permute.xlu0 %1121  ;;  %v1126_v44 = vrot.slane %v1119_v38, %v4361_v55 }
0x1055   :  { %v1130_v47 = vrot.slane %v1122_v42, %v4361_v55 }
0x1057   :  { %v1131_v49 = vsel %vm421_vm3, %v1130_v47, %v1126_v44 }
0x1058   :  { %v1133_v50 = vsel %vm424_vm4, %v1131_v49, 0.0  ;;  %v1156_v60 = vpop.permute.xlu0 %1155 }
0x1059   :  { %1134 = vadd.xlane.f32.xlu1 %v1133_v50 }
0x105c   :  { %v1163_v7 = vpop.permute.xlu0 %1162 }
0x10e6   :  { %v1135_v58 = vpop.xlane.xlu1 %1134 }
0x10e7   :  { %4055 = vrcp.f32 %v1135_v58 }
0x10f1   :  { %v4056_v59 = vpop.eup %4055 }
0x10f2   :  { %v1141_v61 = vrot.slane %v4056_v59, %v4341_v37  ;;  %v1145_v62 = vrot.slane %v4056_v59, %v4370_v63 }
0x10f4   :  { %v4586_v0 = vmul.f32 %v4052_v28, %v1141_v61  ;;  %v4589_v6 = vmul.f32 %v4054_v33, %v1145_v62 }
0x10f6   :  { %v1166_v2 = vmul.f32 %v1156_v60, %v4586_v0  ;;  %v1167_v9 = vmul.f32 %v1163_v7, %v4589_v6 }
0x10f8   :  { %1171 = vperm.xlu0 %4009, %v1166_v2  }
0x10fc   :  { %1174 = vperm.xlu0 %4009, %v1167_v9  }
0x1100   :  { %1186 = vrot.lane.b32.xlu0 %v4541_v25, %s4192_s30 }
0x1177   :  { %v1172_v10 = vpop.permute.xlu0 %1171 }
0x1178   :  { %v1179_v11 = vrot.slane %v1172_v10, %v4361_v55 }
0x117a   :  { %v4599_v15 = vsel %vm3079_vm11, %v3387_v14, %v1179_v11 }
0x117b   :  { %v1175_v18 = vpop.permute.xlu0 %1174 }
0x117c   :  { %v1183_v21 = vrot.slane %v1175_v18, %v4361_v55 }
0x117e   :  { %v4606_v26 = vsel %vm3079_vm11, %v3388_v23, %v1183_v21  ;;  %v1184_v27 = vsel %vm421_vm3, %v1183_v21, %v1179_v11 }
0x117f   :  { %v1187_v13 = vpop.permute.xlu0 %1186 }
0x1180   :  { %v1189_v28 = vsel %vm518_vm6, %v1184_v27, %v1187_v13 }
0x1181   :  { %3692 = vmatmul.mubr.msk.f32.vlgmr.msra.gmra.mrb[6].mxu1 %vm526_vm7, %v1189_v28 }
0x1182   :  { %3910 = vmatpush3.bf16.msra.mxu1 %v4283_v8  ;;  %3710 = vmatprep.mubr.msk.f32.mxu1 %vm4186_vm0, %v4185_v3 }
0x1183   :  { %3911 = vmatprep.subr.bf16.mxu1 %v4187_v5 }
0x1186   :  { %3913 = vmatpush3.bf16.msra.mxu1 %v4292_v12 }
0x1187   :  { %3914 = vmatprep.subr.bf16.mxu1 %v4187_v5 }
0x118a   :  { %3916 = vmatpush3.bf16.msra.mxu1 %v4304_v16 }
0x118b   :  { %3917 = vmatprep.subr.bf16.mxu1 %v4187_v5 }
0x118e   :  { %3919 = vmatpush3.bf16.msra.mxu1 %v4316_v19 }
0x118f   :  { %3938 = vmatprep.subr.bf16.mxu1 %v4187_v5 }
0x1254   :  { %v1259_v51 = vpop.f32.mrb[6].mxu1 }
0x1255   :  { %v1260_v52 = vadd.f32 %v4449_v57, %v1259_v51  ;;  %v3693_v53 = vpop.f32.mrb[7].mxu1 }
0x1257   :  { %4057 = vtanh.f32 %v1260_v52  ;;  %v3443_v33 = vmul.f32 -1.442695, %v1260_v52 }
0x1259   :  { %4059 = vpow2.f32 %v3443_v33 }
0x1261   :  { %v4058_v56 = vpop.eup %4057 }
0x1262   :  { %1272 = vrot.lane.b32.xlu0 %v4058_v56, %s4190_s28 }
0x1263   :  { %v4060_v34 = vpop.eup %4059 }
0x1264   :  { %v1266_v35 = vadd.f32 1.0, %v4060_v34 }
0x1266   :  { %4061 = vrcp.f32 %v1266_v35 }
0x1270   :  { %v4062_v36 = vpop.eup %4061 }
0x1271   :  { %v1270_v44 = vmul.f32 %v4062_v36, %v4537_v20 }
0x12d4   :  { %v1273_v38 = vpop.permute.xlu0 %1272 }
0x12d5   :  { %v1275_v42 = vmul.f32 %v4062_v36, %v1273_v38 }
0x12d7   :  { %1277 = vrot.lane.b32.xlu0 %v1275_v42, %s4190_s28 }
0x1349   :  { %v1278_v47 = vpop.permute.xlu0 %1277 }
0x134a   :  { %v4625_v49 = vadd.f32 %v1278_v47, %v1270_v44 }
0x134c   :  { %4063 = vtanh.f32 %v4625_v49 }
0x1356   :  { %v4064_v50 = vpop.eup %4063 }
0x1357   :  { %1283 = vrot.lane.b32.xlu1 %v4064_v50, %s4190_s28 }
0x13c9   :  { %v1284_v58 = vpop.permute.xlu1 %1283 }
0x13ca   :  { %v4629_v59 = vmul.f32 %v4062_v36, %v1284_v58 }
0x13cc   :  { %1288 = vrot.lane.b32.xlu0 %v4629_v59, %s4191_s29 }
0x143e   :  { %v1289_v60 = vpop.permute.xlu0 %1288 }
0x143f   :  { %v1291_v61 = vsel %vm632_vm8, %v1289_v60, %v4625_v49 }
0x1440   :  { %3711 = vmatmul.mubr.msk.f32.vlgmr.msra.gmra.mrb[8].mxu1 %vm272_vm9, %v1291_v61 }
0x1441   :  { %3940 = vmatpush3.bf16.msra.mxu1 %v4388_v29  ;;  %3755 = vmatprep.mubr.msk.f32.mxu1 %vm4186_vm0, %v4185_v3 }
0x1442   :  { %3941 = vmatprep.subr.bf16.mxu1 %v4187_v5 }
0x1445   :  { %3943 = vmatpush3.bf16.msra.mxu1 %v4407_v46 }
0x1446   :  { %3753 = vmatprep.subr.mxu1 %v4185_v3 }
0x1449   :  { %3754 = vmatpush3.msk.msra.mxu1 %vm530_vm5, %v4417_v48 }
0x144a   :  { %3944 = vmatprep.subr.bf16.mxu1 %v4187_v5 }
0x1513   :  { %v1361_v20 = vpop.f32.mrb[8].mxu1 }
0x1514   :  { %v1362_v62 = vadd.f32 %v4333_v31, %v1361_v20  ;;  %v3712_v2 = vpop.f32.mrb[9].mxu1 }
0x1515   :  { %v1481_v2 = vsub.s32 3, %v4328_v30 }
0x1516   :  { %v1372_v7 = vrot.slane %v1362_v62, %v4336_v32 }
0x1518   :  { %v1373_v9 = vcombine.high %v1372_v7, %v1372_v7  ;;  %v1380_v10 = vrot.slane %v1372_v7, %v4336_v32  ;;  %v1482_v7 = vrot.slane %v4257_v1, %v1481_v2 }
0x151a   :  { %v1387_v11 = vrot.slane %v1373_v9, %v4336_v32  ;;  %v1391_v14 = vrot.slane %v1380_v10, %v4341_v37  ;;  %v1489_v9 = vrot.slane %v4267_v4, %v1481_v2 }
0x151c   :  { %v1395_v18 = vrot.slane %v1387_v11, %v4341_v37  ;;  %v1398_v21 = vadd.f32 %v1391_v14, %v4324_v22 }
0x151e   :  { %v1399_v23 = vadd.f32 %v1395_v18, %v4326_v24  ;;  %4065 = vtanh.f32 %v1398_v21 }
0x1520   :  { %4067 = vtanh.f32 %v1399_v23 }
0x1528   :  { %v4066_v27 = vpop.eup %4065 }
0x1529   :  { %v1402_v31 = vmul.f32 %v4066_v27, %v4352_v45 }
0x152a   :  { %v4068_v13 = vpop.eup %4067 }
0x152b   :  { %v1404_v28 = vsel %vm391_vm2, %v1402_v31, 0.0  ;;  %v1403_v51 = vmul.f32 %v4068_v13, %v4352_v45 }
0x152c   :  { %1405 = vadd.xlane.f32.xlu0 %v1404_v28 }
0x152d   :  { %v1407_v52 = vsel %vm391_vm2, %v1403_v51, 0.0 }
0x152e   :  { %1408 = vadd.xlane.f32.xlu1 %v1407_v52 }
0x15b9   :  { %v1406_v53 = vpop.xlane.xlu0 %1405 }
0x15ba   :  { %v1410_v56 = vadd.f32 %v1406_v53, %v4358_v54 }
0x15bb   :  { %v1409_v33 = vpop.xlane.xlu1 %1408 }
0x15bc   :  { %v1411_v34 = vadd.f32 %v1409_v33, %v4358_v54  ;;  %v1417_v35 = vrot.slane %v1410_v56, %v4361_v55 }
0x15be   :  { %v1421_v36 = vrot.slane %v1411_v34, %v4361_v55 }
0x15c0   :  { %v1422_v38 = vsel %vm421_vm3, %v1421_v36, %v1417_v35 }
0x15c1   :  { %v1424_v42 = vsel %vm424_vm4, %v1422_v38, -inf }
0x15c2   :  { %1425 = vmax.xlane.f32.xlu0 %v1424_v42 }
0x164f   :  { %v1426_v45 = vpop.xlane.xlu0 %1425 }
0x1650   :  { %v1431_v44 = vrot.slane %v1426_v45, %v4341_v37  ;;  %v1435_v47 = vrot.slane %v1426_v45, %v4370_v63 }
0x1652   :  { %v1438_v50 = vsub.f32 %v1410_v56, %v1431_v44  ;;  %v1439_v58 = vsub.f32 %v1411_v34, %v1435_v47 }
0x1654   :  { %v1440_v60 = vmul.f32 1.442695, %v1438_v50  ;;  %v1442_v61 = vmul.f32 1.442695, %v1439_v58 }
0x1656   :  { %4069 = vpow2.f32 %v1440_v60 }
0x1657   :  { %4071 = vpow2.f32 %v1442_v61 }
0x1660   :  { %v4070_v20 = vpop.eup %4069 }
0x1661   :  { %v4072_v62 = vpop.eup %4071  ;;  %1447 = vperm.xlu0 %4009, %v4070_v20  }
0x1662   :  { %1450 = vperm.xlu1 %4010, %v4072_v62  }
0x1666   :  { %1484 = vbcast.lane.b32.xlu1 %v1482_v7, 256 }
0x166a   :  { %1491 = vbcast.lane.b32.xlu1 %v1489_v9, 256 }
0x16e0   :  { %v1448_v10 = vpop.permute.xlu0 %1447 }
0x16e1   :  { %v1451_v11 = vpop.permute.xlu1 %1450  ;;  %v1455_v14 = vrot.slane %v1448_v10, %v4361_v55 }
0x16e2   :  { %v1459_v18 = vrot.slane %v1451_v11, %v4361_v55 }
0x16e4   :  { %v1460_v21 = vsel %vm421_vm3, %v1459_v18, %v1455_v14 }
0x16e5   :  { %v1462_v23 = vsel %vm424_vm4, %v1460_v21, 0.0  ;;  %v1485_v13 = vpop.permute.xlu1 %1484 }
0x16e6   :  { %1463 = vadd.xlane.f32.xlu0 %v1462_v23 }
0x16e9   :  { %v1492_v53 = vpop.permute.xlu1 %1491 }
0x1773   :  { %v1464_v27 = vpop.xlane.xlu0 %1463 }
0x1774   :  { %4073 = vrcp.f32 %v1464_v27 }
0x177e   :  { %v4074_v31 = vpop.eup %4073 }
0x177f   :  { %v1470_v1 = vrot.slane %v4074_v31, %v4341_v37  ;;  %v1474_v4 = vrot.slane %v4074_v31, %v4370_v63  ;;  %v4732_v31 = vld [vmem:[%s5195_s3] ss:$0 sm:$0xff] }
0x1781   :  { %v4674_v28 = vmul.f32 %v4070_v20, %v1470_v1  ;;  %v4677_v52 = vmul.f32 %v4072_v62, %v1474_v4 }
0x1783   :  { %v1495_v51 = vmul.f32 %v1485_v13, %v4674_v28  ;;  %v1496_v56 = vmul.f32 %v1492_v53, %v4677_v52 }
0x1785   :  { %1500 = vperm.xlu1 %4010, %v1495_v51  }
0x1789   :  { %1503 = vperm.xlu1 %4010, %v1496_v56  }
0x178d   :  { %1515 = vrot.lane.b32.xlu1 %v4629_v59, %s4192_s30 }
0x1804   :  { %v1501_v33 = vpop.permute.xlu1 %1500 }
0x1805   :  { %v1508_v34 = vrot.slane %v1501_v33, %v4361_v55 }
0x1807   :  { %v4685_v35 = vsel %vm3082_vm12, %v4599_v15, %v1508_v34 }
0x1808   :  { %v1504_v36 = vpop.permute.xlu1 %1503 }
0x1809   :  { %v1512_v38 = vrot.slane %v1504_v36, %v4361_v55 }
0x180b   :  { %v4690_v42 = vsel %vm3082_vm12, %v4606_v26, %v1512_v38  ;;  %v1513_v45 = vsel %vm421_vm3, %v1512_v38, %v1508_v34 }
0x180c   :  { %v1516_v44 = vpop.permute.xlu1 %1515 }
0x180d   :  { %v1518_v47 = vsel %vm518_vm6, %v1513_v45, %v1516_v44  ;;  %v4745_v45 = vld [vmem:[%s5196_s4] ss:$0 sm:$0xff] }
0x180e   :  { %3724 = vmatmul.mubr.msk.f32.vlgmr.msra.gmra.mrb[8].mxu0 %vm526_vm7, %v1518_v47 }
0x180f   :  { %3928 = vmatpush3.bf16.msra.mxu0 %v4283_v8  ;;  %3742 = vmatprep.mubr.msk.f32.mxu0 %vm4186_vm0, %v4185_v3 }
0x1810   :  { %3929 = vmatprep.subr.bf16.mxu0 %v4187_v5 }
0x1813   :  { %3931 = vmatpush3.bf16.msra.mxu0 %v4292_v12 }
0x1814   :  { %3932 = vmatprep.subr.bf16.mxu0 %v4187_v5 }
0x1817   :  { %3934 = vmatpush3.bf16.msra.mxu0 %v4304_v16 }
0x1818   :  { %3935 = vmatprep.subr.bf16.mxu0 %v4187_v5 }
0x181b   :  { %3937 = vmatpush3.bf16.msra.mxu0 %v4316_v19 }
0x181c   :  { %3956 = vmatprep.subr.bf16.mxu0 %v4187_v5 }
0x18e1   :  { %v1588_v15 = vpop.f32.mrb[8].mxu0 }
0x18e2   :  { %v1589_v26 = vadd.f32 %v4449_v57, %v1588_v15  ;;  %v3725_v50 = vpop.f32.mrb[9].mxu0 }
0x18e4   :  { %4075 = vtanh.f32 %v1589_v26  ;;  %v3447_v60 = vmul.f32 -1.442695, %v1589_v26 }
0x18e6   :  { %4077 = vpow2.f32 %v3447_v60 }
0x18ee   :  { %v4076_v58 = vpop.eup %4075 }
0x18ef   :  { %1601 = vrot.lane.b32.xlu1 %v4076_v58, %s4190_s28 }
0x18f0   :  { %v4078_v61 = vpop.eup %4077 }
0x18f1   :  { %v1595_v20 = vadd.f32 1.0, %v4078_v61 }
0x18f3   :  { %4079 = vrcp.f32 %v1595_v20 }
0x18fd   :  { %v4080_v62 = vpop.eup %4079 }
0x18fe   :  { %v1599_v9 = vmul.f32 %v4080_v62, %v4625_v49 }
0x1961   :  { %v1602_v2 = vpop.permute.xlu1 %1601 }
0x1962   :  { %v1604_v7 = vmul.f32 %v4080_v62, %v1602_v2 }
0x1964   :  { %1606 = vrot.lane.b32.xlu1 %v1604_v7, %s4190_s28 }
0x19d6   :  { %v1607_v10 = vpop.permute.xlu1 %1606 }
0x19d7   :  { %v4709_v11 = vadd.f32 %v1607_v10, %v1599_v9 }
0x19d9   :  { %4081 = vtanh.f32 %v4709_v11 }
0x19e3   :  { %v4082_v14 = vpop.eup %4081 }
0x19e4   :  { %1612 = vrot.lane.b32.xlu0 %v4082_v14, %s4190_s28 }
0x1a56   :  { %v1613_v18 = vpop.permute.xlu0 %1612 }
0x1a57   :  { %v4713_v21 = vmul.f32 %v4080_v62, %v1613_v18 }
0x1a59   :  { %1617 = vrot.lane.b32.xlu1 %v4713_v21, %s4191_s29 }
0x1acb   :  { %v1618_v23 = vpop.permute.xlu1 %1617 }
0x1acc   :  { %v1620_v27 = vsel %vm632_vm8, %v1618_v23, %v4709_v11 }
0x1acd   :  { %3743 = vmatmul.mubr.msk.f32.vlgmr.msra.gmra.mrb[10].mxu0 %vm272_vm9, %v1620_v27 }
0x1ace   :  { %3958 = vmatpush3.bf16.msra.mxu0 %v4388_v29  ;;  %3787 = vmatprep.mubr.msk.f32.mxu0 %vm4186_vm0, %v4185_v3 }
0x1acf   :  { %3959 = vmatprep.subr.bf16.mxu0 %v4187_v5 }
0x1ad2   :  { %3961 = vmatpush3.bf16.msra.mxu0 %v4407_v46 }
0x1ad3   :  { %3785 = vmatprep.subr.mxu0 %v4185_v3 }
0x1ad6   :  { %3786 = vmatpush3.msk.msra.mxu0 %vm530_vm5, %v4417_v48 }
0x1ad7   :  { %3962 = vmatprep.subr.bf16.mxu0 %v4187_v5 }
0x1ba0   :  { %v1690_v49 = vpop.f32.mrb[10].mxu0 }
0x1ba1   :  { %v1691_v13 = vadd.f32 %v4732_v31, %v1690_v49  ;;  %v3744_v1 = vpop.f32.mrb[11].mxu0 }
0x1ba3   :  { %v1701_v4 = vrot.slane %v1691_v13, %v4336_v32 }
0x1ba5   :  { %v1702_v51 = vcombine.high %v1701_v4, %v1701_v4  ;;  %v1709_v53 = vrot.slane %v1701_v4, %v4336_v32 }
0x1ba7   :  { %v1716_v56 = vrot.slane %v1702_v51, %v4336_v32  ;;  %v1720_v48 = vrot.slane %v1709_v53, %v4341_v37  ;;  %v1810_v51 = vsub.s32 4, %v4328_v30  ;;  %v4763_v53 = vld [vmem:[%s5192_s0] sm:$0xff] }
0x1ba9   :  { %v1724_v33 = vrot.slane %v1716_v56, %v4341_v37  ;;  %v1727_v34 = vadd.f32 %v1720_v48, %v4324_v22  ;;  %v1811_v56 = vrot.slane %v4763_v53, %v1810_v51  ;;  %v4769_v48 = vld [vmem:[%s5192_s0 + $0x8] sm:$0xff] }
0x1bab   :  { %v1728_v36 = vadd.f32 %v1724_v33, %v4326_v24  ;;  %4083 = vtanh.f32 %v1727_v34  ;;  %v1818_v33 = vrot.slane %v4769_v48, %v1810_v51 }
0x1bad   :  { %4085 = vtanh.f32 %v1728_v36 }
0x1bb5   :  { %v4084_v38 = vpop.eup %4083 }
0x1bb6   :  { %v1731_v44 = vmul.f32 %v4745_v45, %v4084_v38 }
0x1bb7   :  { %v4086_v47 = vpop.eup %4085 }
0x1bb8   :  { %v1733_v15 = vsel %vm391_vm2, %v1731_v44, 0.0  ;;  %v1732_v26 = vmul.f32 %v4745_v45, %v4086_v47 }
0x1bb9   :  { %1734 = vadd.xlane.f32.xlu1 %v1733_v15 }
0x1bba   :  { %v1736_v50 = vsel %vm391_vm2, %v1732_v26, 0.0 }
0x1bbb   :  { %1737 = vadd.xlane.f32.xlu0 %v1736_v50 }
0x1c46   :  { %v1735_v58 = vpop.xlane.xlu1 %1734 }
0x1c47   :  { %v1739_v60 = vadd.f32 %v1735_v58, %v4358_v54 }
0x1c48   :  { %v1738_v61 = vpop.xlane.xlu0 %1737 }
0x1c49   :  { %v1740_v20 = vadd.f32 %v1738_v61, %v4358_v54  ;;  %v1746_v62 = vrot.slane %v1739_v60, %v4361_v55 }
0x1c4b   :  { %v1750_v2 = vrot.slane %v1740_v20, %v4361_v55 }
0x1c4d   :  { %v1751_v7 = vsel %vm421_vm3, %v1750_v2, %v1746_v62 }
0x1c4e   :  { %v1753_v9 = vsel %vm424_vm4, %v1751_v7, -inf }
0x1c4f   :  { %1754 = vmax.xlane.f32.xlu1 %v1753_v9 }
0x1cdc   :  { %v1755_v10 = vpop.xlane.xlu1 %1754 }
0x1cdd   :  { %v1760_v14 = vrot.slane %v1755_v10, %v4341_v37  ;;  %v1764_v18 = vrot.slane %v1755_v10, %v4370_v63 }
0x1cdf   :  { %v1767_v23 = vsub.f32 %v1739_v60, %v1760_v14  ;;  %v1768_v27 = vsub.f32 %v1740_v20, %v1764_v18 }
0x1ce1   :  { %v1769_v49 = vmul.f32 1.442695, %v1767_v23  ;;  %v1771_v13 = vmul.f32 1.442695, %v1768_v27 }
0x1ce3   :  { %4087 = vpow2.f32 %v1769_v49 }
0x1ce4   :  { %4089 = vpow2.f32 %v1771_v13 }
0x1ced   :  { %v4088_v1 = vpop.eup %4087 }
0x1cee   :  { %v4090_v4 = vpop.eup %4089  ;;  %1776 = vperm.xlu1 %4010, %v4088_v1  }
0x1cef   :  { %1779 = vperm.xlu0 %4009, %v4090_v4  }
0x1cf3   :  { %1813 = vbcast.lane.b32.xlu0 %v1811_v56, 256 }
0x1cf7   :  { %1820 = vbcast.lane.b32.xlu0 %v1818_v33, 256 }
0x1d6d   :  { %v1777_v34 = vpop.permute.xlu1 %1776 }
0x1d6e   :  { %v1780_v36 = vpop.permute.xlu0 %1779  ;;  %v1784_v38 = vrot.slane %v1777_v34, %v4361_v55 }
0x1d6f   :  { %v1788_v44 = vrot.slane %v1780_v36, %v4361_v55 }
0x1d71   :  { %v1789_v47 = vsel %vm421_vm3, %v1788_v44, %v1784_v38 }
0x1d72   :  { %v1791_v15 = vsel %vm424_vm4, %v1789_v47, 0.0  ;;  %v1814_v58 = vpop.permute.xlu0 %1813 }
0x1d73   :  { %1792 = vadd.xlane.f32.xlu1 %v1791_v15 }
0x1d76   :  { %v1821_v7 = vpop.permute.xlu0 %1820 }
0x1e00   :  { %v1793_v26 = vpop.xlane.xlu1 %1792 }
0x1e01   :  { %4091 = vrcp.f32 %v1793_v26 }
0x1e0b   :  { %v4092_v50 = vpop.eup %4091 }
0x1e0c   :  { %v1799_v60 = vrot.slane %v4092_v50, %v4341_v37  ;;  %v1803_v61 = vrot.slane %v4092_v50, %v4370_v63 }
0x1e0e   :  { %v4778_v20 = vmul.f32 %v4088_v1, %v1799_v60  ;;  %v4781_v2 = vmul.f32 %v4090_v4, %v1803_v61 }
0x1e10   :  { %v1824_v62 = vmul.f32 %v1814_v58, %v4778_v20  ;;  %v1825_v9 = vmul.f32 %v1821_v7, %v4781_v2 }
0x1e12   :  { %1829 = vperm.xlu0 %4009, %v1824_v62  }
0x1e16   :  { %1832 = vperm.xlu0 %4009, %v1825_v9  }
0x1e1a   :  { %1844 = vrot.lane.b32.xlu0 %v4713_v21, %s4192_s30 }
0x1e91   :  { %v1830_v10 = vpop.permute.xlu0 %1829 }
0x1e92   :  { %v1837_v14 = vrot.slane %v1830_v10, %v4361_v55 }
0x1e94   :  { %v4789_v18 = vsel %vm530_vm5, %v4685_v35, %v1837_v14 }
0x1e95   :  { %v1833_v23 = vpop.permute.xlu0 %1832 }
0x1e96   :  { %v1841_v27 = vrot.slane %v1833_v23, %v4361_v55 }
0x1e98   :  { %v4794_v49 = vsel %vm530_vm5, %v4690_v42, %v1841_v27  ;;  %v1842_v13 = vsel %vm421_vm3, %v1841_v27, %v1837_v14 }
0x1e99   :  { %v1845_v1 = vpop.permute.xlu0 %1844 }
0x1e9a   :  { %v1847_v4 = vsel %vm518_vm6, %v1842_v13, %v1845_v1 }
0x1e9b   :  { %3756 = vmatmul.mubr.msk.f32.vlgmr.msra.gmra.mrb[10].mxu1 %vm526_vm7, %v1847_v4 }
0x1e9c   :  { %3946 = vmatpush3.bf16.msra.mxu1 %v4283_v8  ;;  %3774 = vmatprep.mubr.msk.f32.mxu1 %vm4186_vm0, %v4185_v3 }
0x1e9d   :  { %3947 = vmatprep.subr.bf16.mxu1 %v4187_v5 }
0x1ea0   :  { %3949 = vmatpush3.bf16.msra.mxu1 %v4292_v12 }
0x1ea1   :  { %3950 = vmatprep.subr.bf16.mxu1 %v4187_v5 }
0x1ea4   :  { %3952 = vmatpush3.bf16.msra.mxu1 %v4304_v16 }
0x1ea5   :  { %3953 = vmatprep.subr.bf16.mxu1 %v4187_v5 }
0x1ea8   :  { %3955 = vmatpush3.bf16.msra.mxu1 %v4316_v19 }
0x1ea9   :  { %3974 = vmatprep.subr.bf16.mxu1 %v4187_v5 }
0x1f6e   :  { %v1917_v35 = vpop.f32.mrb[10].mxu1 }
0x1f6f   :  { %v1918_v42 = vadd.f32 %v4449_v57, %v1917_v35  ;;  %v3757_v51 = vpop.f32.mrb[11].mxu1 }
0x1f71   :  { %4093 = vtanh.f32 %v1918_v42  ;;  %v3451_v33 = vmul.f32 -1.442695, %v1918_v42 }
0x1f73   :  { %4095 = vpow2.f32 %v3451_v33 }
0x1f7b   :  { %v4094_v56 = vpop.eup %4093 }
0x1f7c   :  { %1930 = vrot.lane.b32.xlu0 %v4094_v56, %s4190_s28 }
0x1f7d   :  { %v4096_v34 = vpop.eup %4095 }
0x1f7e   :  { %v1924_v36 = vadd.f32 1.0, %v4096_v34 }
0x1f80   :  { %4097 = vrcp.f32 %v1924_v36 }
0x1f8a   :  { %v4098_v38 = vpop.eup %4097 }
0x1f8b   :  { %v1928_v15 = vmul.f32 %v4098_v38, %v4709_v11  ;;  %v4833_v11 = vld [vmem:[%s5198_s6 + $0x20] sm:$0xf] }
0x1fee   :  { %v1931_v44 = vpop.permute.xlu0 %1930 }
0x1fef   :  { %v1933_v47 = vmul.f32 %v4098_v38, %v1931_v44 }
0x1ff1   :  { %1935 = vrot.lane.b32.xlu0 %v1933_v47, %s4190_s28 }
0x2063   :  { %v1936_v26 = vpop.permute.xlu0 %1935 }
0x2064   :  { %v4813_v50 = vadd.f32 %v1936_v26, %v1928_v15 }
0x2066   :  { %4099 = vtanh.f32 %v4813_v50 }
0x2070   :  { %v4100_v57 = vpop.eup %4099 }
0x2071   :  { %1941 = vrot.lane.b32.xlu1 %v4100_v57, %s4190_s28 }
0x20e3   :  { %v1942_v58 = vpop.permute.xlu1 %1941 }
0x20e4   :  { %v4817_v60 = vmul.f32 %v4098_v38, %v1942_v58 }
0x20e6   :  { %1946 = vrot.lane.b32.xlu0 %v4817_v60, %s4191_s29 }
0x2158   :  { %v1947_v61 = vpop.permute.xlu0 %1946 }
0x2159   :  { %v1949_v62 = vsel %vm632_vm8, %v1947_v61, %v4813_v50 }
0x215a   :  { %3775 = vmatmul.mubr.msk.f32.vlgmr.msra.gmra.mrb[12].mxu1 %vm272_vm9, %v1949_v62 }
0x215b   :  { %3976 = vmatpush3.bf16.msra.mxu1 %v4388_v29  ;;  %3819 = vmatprep.mubr.msk.f32.mxu1 %vm4186_vm0, %v4185_v3 }
0x215c   :  { %3977 = vmatprep.subr.bf16.mxu1 %v4187_v5 }
0x215f   :  { %3979 = vmatpush3.bf16.msra.mxu1 %v4407_v46 }
0x2160   :  { %3817 = vmatprep.subr.mxu1 %v4185_v3 }
0x2163   :  { %3818 = vmatpush3.msk.msra.mxu1 %vm530_vm5, %v4833_v11 }
0x2164   :  { %3980 = vmatprep.subr.bf16.mxu1 %v4187_v5 }
0x222d   :  { %v2019_v7 = vpop.f32.mrb[12].mxu1 }
0x222e   :  { %v2020_v9 = vadd.f32 %v4732_v31, %v2019_v7  ;;  %v3776_v10 = vpop.f32.mrb[13].mxu1 }
0x2230   :  { %v2030_v14 = vrot.slane %v2020_v9, %v4336_v32 }
0x2232   :  { %v2031_v23 = vcombine.high %v2030_v14, %v2030_v14  ;;  %v2038_v27 = vrot.slane %v2030_v14, %v4336_v32 }
0x2234   :  { %v2045_v13 = vrot.slane %v2031_v23, %v4336_v32  ;;  %v2049_v1 = vrot.slane %v2038_v27, %v4341_v37 }
0x2236   :  { %v2053_v4 = vrot.slane %v2045_v13, %v4341_v37  ;;  %v2056_v35 = vadd.f32 %v2049_v1, %v4324_v22 }
0x2238   :  { %v2057_v42 = vadd.f32 %v2053_v4, %v4326_v24  ;;  %4101 = vtanh.f32 %v2056_v35  ;;  %v2139_v35 = vsub.s32 5, %v4328_v30 }
0x223a   :  { %4103 = vtanh.f32 %v2057_v42  ;;  %v2140_v42 = vrot.slane %v4763_v53, %v2139_v35 }
0x2242   :  { %v4102_v51 = vpop.eup %4101 }
0x2243   :  { %v2060_v56 = vmul.f32 %v4745_v45, %v4102_v51  ;;  %v2147_v51 = vrot.slane %v4769_v48, %v2139_v35 }
0x2244   :  { %v4104_v33 = vpop.eup %4103 }
0x2245   :  { %v2062_v34 = vsel %vm391_vm2, %v2060_v56, 0.0  ;;  %v2061_v36 = vmul.f32 %v4745_v45, %v4104_v33 }
0x2246   :  { %2063 = vadd.xlane.f32.xlu0 %v2062_v34 }
0x2247   :  { %v2065_v38 = vsel %vm391_vm2, %v2061_v36, 0.0 }
0x2248   :  { %2066 = vadd.xlane.f32.xlu1 %v2065_v38 }
0x22d3   :  { %v2064_v44 = vpop.xlane.xlu0 %2063 }
0x22d4   :  { %v2068_v47 = vadd.f32 %v2064_v44, %v4358_v54 }
0x22d5   :  { %v2067_v15 = vpop.xlane.xlu1 %2066 }
0x22d6   :  { %v2069_v26 = vadd.f32 %v2067_v15, %v4358_v54  ;;  %v2075_v57 = vrot.slane %v2068_v47, %v4361_v55 }
0x22d8   :  { %v2079_v58 = vrot.slane %v2069_v26, %v4361_v55 }
0x22da   :  { %v2080_v61 = vsel %vm421_vm3, %v2079_v58, %v2075_v57 }
0x22db   :  { %v2082_v62 = vsel %vm424_vm4, %v2080_v61, -inf }
0x22dc   :  { %2083 = vmax.xlane.f32.xlu0 %v2082_v62 }
0x2369   :  { %v2084_v7 = vpop.xlane.xlu0 %2083 }
0x236a   :  { %v2089_v9 = vrot.slane %v2084_v7, %v4341_v37  ;;  %v2093_v10 = vrot.slane %v2084_v7, %v4370_v63 }
0x236c   :  { %v2096_v14 = vsub.f32 %v2068_v47, %v2089_v9  ;;  %v2097_v23 = vsub.f32 %v2069_v26, %v2093_v10 }
0x236e   :  { %v2098_v27 = vmul.f32 1.442695, %v2096_v14  ;;  %v2100_v13 = vmul.f32 1.442695, %v2097_v23 }
0x2370   :  { %4105 = vpow2.f32 %v2098_v27 }
0x2371   :  { %4107 = vpow2.f32 %v2100_v13 }
0x237a   :  { %v4106_v1 = vpop.eup %4105 }
0x237b   :  { %v4108_v4 = vpop.eup %4107  ;;  %2105 = vperm.xlu0 %4009, %v4106_v1  }
0x237c   :  { %2108 = vperm.xlu1 %4010, %v4108_v4  }
0x2380   :  { %2142 = vbcast.lane.b32.xlu1 %v2140_v42, 256 }
0x2384   :  { %2149 = vbcast.lane.b32.xlu1 %v2147_v51, 256 }
0x23fa   :  { %v2106_v56 = vpop.permute.xlu0 %2105 }
0x23fb   :  { %v2109_v33 = vpop.permute.xlu1 %2108  ;;  %v2113_v34 = vrot.slane %v2106_v56, %v4361_v55 }
0x23fc   :  { %v2117_v36 = vrot.slane %v2109_v33, %v4361_v55 }
0x23fe   :  { %v2118_v38 = vsel %vm421_vm3, %v2117_v36, %v2113_v34 }
0x23ff   :  { %v2120_v44 = vsel %vm424_vm4, %v2118_v38, 0.0  ;;  %v2143_v26 = vpop.permute.xlu1 %2142 }
0x2400   :  { %2121 = vadd.xlane.f32.xlu0 %v2120_v44 }
0x2403   :  { %v2150_v9 = vpop.permute.xlu1 %2149 }
0x248d   :  { %v2122_v47 = vpop.xlane.xlu0 %2121 }
0x248e   :  { %4109 = vrcp.f32 %v2122_v47 }
0x2498   :  { %v4110_v15 = vpop.eup %4109 }
0x2499   :  { %v2128_v57 = vrot.slane %v4110_v15, %v4341_v37  ;;  %v2132_v58 = vrot.slane %v4110_v15, %v4370_v63 }
0x249b   :  { %v4867_v61 = vmul.f32 %v4106_v1, %v2128_v57  ;;  %v4870_v7 = vmul.f32 %v4108_v4, %v2132_v58 }
0x249d   :  { %v2153_v62 = vmul.f32 %v2143_v26, %v4867_v61  ;;  %v2154_v10 = vmul.f32 %v2150_v9, %v4870_v7 }
0x249f   :  { %2158 = vperm.xlu1 %4010, %v2153_v62  }
0x24a3   :  { %2161 = vperm.xlu1 %4010, %v2154_v10  }
0x24a7   :  { %2173 = vrot.lane.b32.xlu1 %v4817_v60, %s4192_s30 }
0x251e   :  { %v2159_v14 = vpop.permute.xlu1 %2158 }
0x251f   :  { %v2166_v23 = vrot.slane %v2159_v14, %v4361_v55 }
0x2521   :  { %v4878_v27 = vsel %vm3087_vm13, %v4789_v18, %v2166_v23 }
0x2522   :  { %v2162_v13 = vpop.permute.xlu1 %2161 }
0x2523   :  { %v2170_v1 = vrot.slane %v2162_v13, %v4361_v55 }
0x2525   :  { %v4883_v4 = vsel %vm3087_vm13, %v4794_v49, %v2170_v1  ;;  %v2171_v35 = vsel %vm421_vm3, %v2170_v1, %v2166_v23  ;;  %v4901_v49 = vld [vmem:[%s5199_s7] ss:$0 sm:$0xff] }
0x2526   :  { %v2174_v42 = vpop.permute.xlu1 %2173 }
0x2527   :  { %v2176_v51 = vsel %vm518_vm6, %v2171_v35, %v2174_v42 }
0x2528   :  { %3788 = vmatmul.mubr.msk.f32.vlgmr.msra.gmra.mrb[12].mxu0 %vm526_vm7, %v2176_v51 }
0x2529   :  { %3964 = vmatpush3.bf16.msra.mxu0 %v4283_v8  ;;  %3806 = vmatprep.mubr.msk.f32.mxu0 %vm4186_vm0, %v4185_v3 }
0x252a   :  { %3965 = vmatprep.subr.bf16.mxu0 %v4187_v5 }
0x252d   :  { %3967 = vmatpush3.bf16.msra.mxu0 %v4292_v12 }
0x252e   :  { %3968 = vmatprep.subr.bf16.mxu0 %v4187_v5 }
0x2531   :  { %3970 = vmatpush3.bf16.msra.mxu0 %v4304_v16 }
0x2532   :  { %3971 = vmatprep.subr.bf16.mxu0 %v4187_v5 }
0x2535   :  { %3973 = vmatpush3.bf16.msra.mxu0 %v4316_v19 }
0x2536   :  { %3992 = vmatprep.subr.bf16.mxu0 %v4187_v5 }
0x25fb   :  { %v2246_v18 = vpop.f32.mrb[12].mxu0 }
0x25fc   :  { %v2247_v56 = vadd.f32 %v4901_v49, %v2246_v18  ;;  %v3789_v33 = vpop.f32.mrb[13].mxu0 }
0x25fe   :  { %4111 = vtanh.f32 %v2247_v56  ;;  %v3455_v36 = vmul.f32 -1.442695, %v2247_v56 }
0x2600   :  { %4113 = vpow2.f32 %v3455_v36 }
0x2608   :  { %v4112_v34 = vpop.eup %4111 }
0x2609   :  { %2259 = vrot.lane.b32.xlu1 %v4112_v34, %s4190_s28 }
0x260a   :  { %v4114_v38 = vpop.eup %4113 }
0x260b   :  { %v2253_v44 = vadd.f32 1.0, %v4114_v38 }
0x260d   :  { %4115 = vrcp.f32 %v2253_v44 }
0x2617   :  { %v4116_v47 = vpop.eup %4115 }
0x2618   :  { %v2257_v57 = vmul.f32 %v4116_v47, %v4813_v50 }
0x267b   :  { %v2260_v15 = vpop.permute.xlu1 %2259 }
0x267c   :  { %v2262_v26 = vmul.f32 %v4116_v47, %v2260_v15 }
0x267e   :  { %2264 = vrot.lane.b32.xlu1 %v2262_v26, %s4190_s28 }
0x26f0   :  { %v2265_v58 = vpop.permute.xlu1 %2264 }
0x26f1   :  { %v4907_v62 = vadd.f32 %v2265_v58, %v2257_v57 }
0x26f3   :  { %4117 = vtanh.f32 %v4907_v62 }
0x26fd   :  { %v4118_v9 = vpop.eup %4117 }
0x26fe   :  { %2270 = vrot.lane.b32.xlu0 %v4118_v9, %s4190_s28 }
0x2770   :  { %v2271_v10 = vpop.permute.xlu0 %2270 }
0x2771   :  { %v4911_v14 = vmul.f32 %v4116_v47, %v2271_v10 }
0x2773   :  { %2275 = vrot.lane.b32.xlu1 %v4911_v14, %s4191_s29 }
0x27e5   :  { %v2276_v23 = vpop.permute.xlu1 %2275 }
0x27e6   :  { %v2278_v13 = vsel %vm632_vm8, %v2276_v23, %v4907_v62 }
0x27e7   :  { %3807 = vmatmul.mubr.msk.f32.vlgmr.msra.gmra.mrb[14].mxu0 %vm272_vm9, %v2278_v13 }
0x27e8   :  { %3994 = vmatpush3.bf16.msra.mxu0 %v4388_v29  ;;  %3851 = vmatprep.mubr.msk.f32.mxu0 %vm4186_vm0, %v4185_v3 }
0x27e9   :  { %3995 = vmatprep.subr.bf16.mxu0 %v4187_v5 }
0x27ec   :  { %3997 = vmatpush3.bf16.msra.mxu0 %v4407_v46 }
0x27ed   :  { %3849 = vmatprep.subr.mxu0 %v4185_v3 }
0x27f0   :  { %3850 = vmatpush3.msk.msra.mxu0 %vm530_vm5, %v4833_v11 }
0x28ba   :  { %v2348_v50 = vpop.f32.mrb[14].mxu0 }
0x28bb   :  { %v2349_v1 = vadd.f32 %v4732_v31, %v2348_v50  ;;  %v3808_v35 = vpop.f32.mrb[15].mxu0 }
0x28bd   :  { %v2359_v42 = vrot.slane %v2349_v1, %v4336_v32 }
0x28bf   :  { %v2360_v51 = vcombine.high %v2359_v42, %v2359_v42  ;;  %v2367_v29 = vrot.slane %v2359_v42, %v4336_v32 }
0x28c1   :  { %v2374_v18 = vrot.slane %v2360_v51, %v4336_v32  ;;  %v2378_v56 = vrot.slane %v2367_v29, %v4341_v37 }
0x28c3   :  { %v2382_v46 = vrot.slane %v2374_v18, %v4341_v37  ;;  %v2385_v33 = vadd.f32 %v2378_v56, %v4324_v22 }
0x28c5   :  { %v2386_v34 = vadd.f32 %v2382_v46, %v4326_v24  ;;  %4119 = vtanh.f32 %v2385_v33 }
0x28c7   :  { %4121 = vtanh.f32 %v2386_v34  ;;  %v2468_v34 = vsub.s32 6, %v4328_v30 }
0x28cf   :  { %v4120_v11 = vpop.eup %4119 }
0x28d0   :  { %v2389_v36 = vmul.f32 %v4745_v45, %v4120_v11  ;;  %v2469_v11 = vrot.slane %v4763_v53, %v2468_v34 }
0x28d1   :  { %v4122_v38 = vpop.eup %4121 }
0x28d2   :  { %v2391_v44 = vsel %vm391_vm2, %v2389_v36, 0.0  ;;  %v2390_v47 = vmul.f32 %v4745_v45, %v4122_v38  ;;  %v2476_v36 = vrot.slane %v4769_v48, %v2468_v34 }
0x28d3   :  { %2392 = vadd.xlane.f32.xlu1 %v2391_v44 }
0x28d4   :  { %v2394_v15 = vsel %vm391_vm2, %v2390_v47, 0.0 }
0x28d5   :  { %2395 = vadd.xlane.f32.xlu0 %v2394_v15 }
0x2960   :  { %v2393_v26 = vpop.xlane.xlu1 %2392 }
0x2961   :  { %v2397_v57 = vadd.f32 %v2393_v26, %v4358_v54 }
0x2962   :  { %v2396_v58 = vpop.xlane.xlu0 %2395 }
0x2963   :  { %v2398_v9 = vadd.f32 %v2396_v58, %v4358_v54  ;;  %v2404_v10 = vrot.slane %v2397_v57, %v4361_v55 }
0x2965   :  { %v2408_v23 = vrot.slane %v2398_v9, %v4361_v55 }
0x2967   :  { %v2409_v13 = vsel %vm421_vm3, %v2408_v23, %v2404_v10 }
0x2968   :  { %v2411_v50 = vsel %vm424_vm4, %v2409_v13, -inf }
0x2969   :  { %2412 = vmax.xlane.f32.xlu1 %v2411_v50 }
0x29f6   :  { %v2413_v1 = vpop.xlane.xlu1 %2412 }
0x29f7   :  { %v2418_v35 = vrot.slane %v2413_v1, %v4341_v37  ;;  %v2422_v42 = vrot.slane %v2413_v1, %v4370_v63 }
0x29f9   :  { %v2425_v51 = vsub.f32 %v2397_v57, %v2418_v35  ;;  %v2426_v29 = vsub.f32 %v2398_v9, %v2422_v42 }
0x29fb   :  { %v2427_v18 = vmul.f32 1.442695, %v2425_v51  ;;  %v2429_v56 = vmul.f32 1.442695, %v2426_v29 }
0x29fd   :  { %4123 = vpow2.f32 %v2427_v18 }
0x29fe   :  { %4125 = vpow2.f32 %v2429_v56 }
0x2a07   :  { %v4124_v46 = vpop.eup %4123 }
0x2a08   :  { %v4126_v33 = vpop.eup %4125  ;;  %2434 = vperm.xlu1 %4010, %v4124_v46  }
0x2a09   :  { %2437 = vperm.xlu0 %4009, %v4126_v33  }
0x2a0d   :  { %2471 = vbcast.lane.b32.xlu0 %v2469_v11, 256 }
0x2a11   :  { %2478 = vbcast.lane.b32.xlu0 %v2476_v36, 256 }
0x2a87   :  { %v2435_v38 = vpop.permute.xlu1 %2434 }
0x2a88   :  { %v2438_v44 = vpop.permute.xlu0 %2437  ;;  %v2442_v47 = vrot.slane %v2435_v38, %v4361_v55 }
0x2a89   :  { %v2446_v15 = vrot.slane %v2438_v44, %v4361_v55 }
0x2a8b   :  { %v2447_v26 = vsel %vm421_vm3, %v2446_v15, %v2442_v47 }
0x2a8c   :  { %v2449_v57 = vsel %vm424_vm4, %v2447_v26, 0.0  ;;  %v2472_v10 = vpop.permute.xlu0 %2471 }
0x2a8d   :  { %2450 = vadd.xlane.f32.xlu1 %v2449_v57 }
0x2a90   :  { %v2479_v42 = vpop.permute.xlu0 %2478 }
0x2b1a   :  { %v2451_v58 = vpop.xlane.xlu1 %2450 }
0x2b1b   :  { %4127 = vrcp.f32 %v2451_v58 }
0x2b25   :  { %v4128_v9 = vpop.eup %4127 }
0x2b26   :  { %v2457_v23 = vrot.slane %v4128_v9, %v4341_v37  ;;  %v2461_v13 = vrot.slane %v4128_v9, %v4370_v63 }
0x2b28   :  { %v4955_v50 = vmul.f32 %v4124_v46, %v2457_v23  ;;  %v4958_v35 = vmul.f32 %v4126_v33, %v2461_v13 }
0x2b2a   :  { %v2482_v1 = vmul.f32 %v2472_v10, %v4955_v50  ;;  %v2483_v51 = vmul.f32 %v2479_v42, %v4958_v35 }
0x2b2c   :  { %2487 = vperm.xlu0 %4009, %v2482_v1  }
0x2b30   :  { %2490 = vperm.xlu0 %4009, %v2483_v51  }
0x2b34   :  { %2502 = vrot.lane.b32.xlu0 %v4911_v14, %s4192_s30 }
0x2bab   :  { %v2488_v29 = vpop.permute.xlu0 %2487 }
0x2bac   :  { %v2495_v18 = vrot.slane %v2488_v29, %v4361_v55 }
0x2bae   :  { %v4966_v56 = vsel %vm3090_vm14, %v4878_v27, %v2495_v18 }
0x2baf   :  { %v2491_v46 = vpop.permute.xlu0 %2490 }
0x2bb0   :  { %v2499_v33 = vrot.slane %v2491_v46, %v4361_v55 }
0x2bb2   :  { %v4971_v34 = vsel %vm3090_vm14, %v4883_v4, %v2499_v33  ;;  %v2500_v11 = vsel %vm421_vm3, %v2499_v33, %v2495_v18 }
0x2bb3   :  { %v2503_v36 = vpop.permute.xlu0 %2502 }
0x2bb4   :  { %v2505_v38 = vsel %vm518_vm6, %v2500_v11, %v2503_v36 }
0x2bb5   :  { %3820 = vmatmul.mubr.msk.f32.vlgmr.msra.gmra.mrb[14].mxu1 %vm526_vm7, %v2505_v38 }
0x2bb6   :  { %3982 = vmatpush3.bf16.msra.mxu1 %v4283_v8  ;;  %3838 = vmatprep.mubr.msk.f32.mxu1 %vm4186_vm0, %v4185_v3 }
0x2bb7   :  { %3983 = vmatprep.subr.bf16.mxu1 %v4187_v5 }
0x2bba   :  { %3985 = vmatpush3.bf16.msra.mxu1 %v4292_v12 }
0x2bbb   :  { %3986 = vmatprep.subr.bf16.mxu1 %v4187_v5 }
0x2bbe   :  { %3988 = vmatpush3.bf16.msra.mxu1 %v4304_v16 }
0x2bbf   :  { %3989 = vmatprep.subr.bf16.mxu1 %v4187_v5 }
0x2bc2   :  { %3991 = vmatpush3.bf16.msra.mxu1 %v4316_v19 }
0x2c88   :  { %v2575_v27 = vpop.f32.mrb[14].mxu1 }
0x2c89   :  { %v2576_v4 = vadd.f32 %v4901_v49, %v2575_v27  ;;  %v3821_v44 = vpop.f32.mrb[15].mxu1 }
0x2c8b   :  { %4129 = vtanh.f32 %v2576_v4  ;;  %v3459_v3 = vmul.f32 -1.442695, %v2576_v4 }
0x2c8d   :  { %4131 = vpow2.f32 %v3459_v3 }
0x2c95   :  { %v4130_v8 = vpop.eup %4129 }
0x2c96   :  { %2588 = vrot.lane.b32.xlu0 %v4130_v8, %s4190_s28 }
0x2c97   :  { %v4132_v47 = vpop.eup %4131 }
0x2c98   :  { %v2582_v12 = vadd.f32 1.0, %v4132_v47 }
0x2c9a   :  { %4133 = vrcp.f32 %v2582_v12 }
0x2ca4   :  { %v4134_v15 = vpop.eup %4133 }
0x2ca5   :  { %v2586_v5 = vmul.f32 %v4134_v15, %v4907_v62 }
0x2d08   :  { %v2589_v26 = vpop.permute.xlu0 %2588 }
0x2d09   :  { %v2591_v16 = vmul.f32 %v4134_v15, %v2589_v26 }
0x2d0b   :  { %2593 = vrot.lane.b32.xlu0 %v2591_v16, %s4190_s28 }
0x2d7d   :  { %v2594_v19 = vpop.permute.xlu0 %2593 }
0x2d7e   :  { %v4989_v57 = vadd.f32 %v2594_v19, %v2586_v5 }
0x2d80   :  { %4135 = vtanh.f32 %v4989_v57 }
0x2d8a   :  { %v4136_v58 = vpop.eup %4135 }
0x2d8b   :  { %2599 = vrot.lane.b32.xlu1 %v4136_v58, %s4190_s28 }
0x2dfd   :  { %v2600_v9 = vpop.permute.xlu1 %2599 }
0x2dfe   :  { %v4993_v10 = vmul.f32 %v4134_v15, %v2600_v9 }
0x2e00   :  { %2604 = vrot.lane.b32.xlu0 %v4993_v10, %s4191_s29 }
0x2e72   :  { %v2605_v23 = vpop.permute.xlu0 %2604 }
0x2e73   :  { %v2607_v13 = vsel %vm632_vm8, %v2605_v23, %v4989_v57 }
0x2e74   :  { %3839 = vmatmul.mubr.msk.f32.vlgmr.msra.gmra.mrb[16].mxu1 %vm272_vm9, %v2607_v13 }
0x2f47   :  { %v2677_v62 = vpop.f32.mrb[16].mxu1 }
0x2f48   :  { %v2678_v1 = vadd.f32 %v4732_v31, %v2677_v62  ;;  %v3840_v42 = vpop.f32.mrb[17].mxu1 }
0x2f49   :  { %v2797_v42 = vsub.s32 7, %v4328_v30 }
0x2f4a   :  { %v2688_v51 = vrot.slane %v2678_v1, %v4336_v32 }
0x2f4c   :  { %v2689_v29 = vcombine.high %v2688_v51, %v2688_v51  ;;  %v2696_v18 = vrot.slane %v2688_v51, %v4336_v32  ;;  %v2798_v51 = vrot.slane %v4763_v53, %v2797_v42 }
0x2f4e   :  { %v2703_v46 = vrot.slane %v2689_v29, %v4336_v32  ;;  %v2707_v33 = vrot.slane %v2696_v18, %v4341_v37  ;;  %v2805_v29 = vrot.slane %v4769_v48, %v2797_v42 }
0x2f50   :  { %v2711_v11 = vrot.slane %v2703_v46, %v4341_v37  ;;  %v2714_v36 = vadd.f32 %v2707_v33, %v4324_v22 }
0x2f52   :  { %v2715_v38 = vadd.f32 %v2711_v11, %v4326_v24  ;;  %4137 = vtanh.f32 %v2714_v36 }
0x2f54   :  { %4139 = vtanh.f32 %v2715_v38 }
0x2f5c   :  { %v4138_v27 = vpop.eup %4137 }
0x2f5d   :  { %v2718_v31 = vmul.f32 %v4745_v45, %v4138_v27 }
0x2f5e   :  { %v4140_v4 = vpop.eup %4139 }
0x2f5f   :  { %v2720_v44 = vsel %vm391_vm2, %v2718_v31, 0.0  ;;  %v2719_v8 = vmul.f32 %v4745_v45, %v4140_v4 }
0x2f60   :  { %2721 = vadd.xlane.f32.xlu0 %v2720_v44 }
0x2f61   :  { %v2723_v3 = vsel %vm391_vm2, %v2719_v8, 0.0 }
0x2f62   :  { %2724 = vadd.xlane.f32.xlu1 %v2723_v3 }
0x2fed   :  { %v2722_v47 = vpop.xlane.xlu0 %2721 }
0x2fee   :  { %v2726_v12 = vadd.f32 %v2722_v47, %v4358_v54 }
0x2fef   :  { %v2725_v22 = vpop.xlane.xlu1 %2724 }
0x2ff0   :  { %v2727_v24 = vadd.f32 %v2725_v22, %v4358_v54  ;;  %v2733_v15 = vrot.slane %v2726_v12, %v4361_v55 }
0x2ff2   :  { %v2737_v26 = vrot.slane %v2727_v24, %v4361_v55 }
0x2ff4   :  { %v2738_v16 = vsel %vm421_vm3, %v2737_v26, %v2733_v15 }
0x2ff5   :  { %v2740_v5 = vsel %vm424_vm4, %v2738_v16, -inf }
0x2ff6   :  { %2741 = vmax.xlane.f32.xlu0 %v2740_v5 }
0x3083   :  { %v2742_v45 = vpop.xlane.xlu0 %2741 }
0x3084   :  { %v2747_v19 = vrot.slane %v2742_v45, %v4341_v37  ;;  %v2751_v58 = vrot.slane %v2742_v45, %v4370_v63 }
0x3086   :  { %v2754_v9 = vsub.f32 %v2726_v12, %v2747_v19  ;;  %v2755_v23 = vsub.f32 %v2727_v24, %v2751_v58 }
0x3088   :  { %v2756_v13 = vmul.f32 1.442695, %v2754_v9  ;;  %v2758_v62 = vmul.f32 1.442695, %v2755_v23 }
0x308a   :  { %4141 = vpow2.f32 %v2756_v13 }
0x308b   :  { %4143 = vpow2.f32 %v2758_v62 }
0x3094   :  { %v4142_v54 = vpop.eup %4141 }
0x3095   :  { %v4144_v1 = vpop.eup %4143  ;;  %2763 = vperm.xlu0 %4009, %v4142_v54  }
0x3096   :  { %2766 = vperm.xlu1 %4010, %v4144_v1  }
0x309a   :  { %2800 = vbcast.lane.b32.xlu1 %v2798_v51, 256 }
0x309e   :  { %2807 = vbcast.lane.b32.xlu1 %v2805_v29, 256 }
0x3114   :  { %v2764_v18 = vpop.permute.xlu0 %2763 }
0x3115   :  { %v2767_v46 = vpop.permute.xlu1 %2766  ;;  %v2771_v33 = vrot.slane %v2764_v18, %v4361_v55 }
0x3116   :  { %v2775_v11 = vrot.slane %v2767_v46, %v4361_v55 }
0x3118   :  { %v2776_v36 = vsel %vm421_vm3, %v2775_v11, %v2771_v33 }
0x3119   :  { %v2778_v38 = vsel %vm424_vm4, %v2776_v36, 0.0  ;;  %v2801_v31 = vpop.permute.xlu1 %2800 }
0x311a   :  { %2779 = vadd.xlane.f32.xlu0 %v2778_v38 }
0x311d   :  { %v2808_v3 = vpop.permute.xlu1 %2807 }
0x31a7   :  { %v2780_v27 = vpop.xlane.xlu0 %2779 }
0x31a8   :  { %4145 = vrcp.f32 %v2780_v27 }
0x31b2   :  { %v4146_v30 = vpop.eup %4145 }
0x31b3   :  { %v2786_v53 = vrot.slane %v4146_v30, %v4341_v37  ;;  %v2790_v48 = vrot.slane %v4146_v30, %v4370_v63 }
0x31b5   :  { %v2793_v4 = vmul.f32 %v4142_v54, %v2786_v53  ;;  %v5029_v8 = vmul.f32 %v4144_v1, %v2790_v48 }
0x31b7   :  { %v2811_v44 = vmul.f32 %v2801_v31, %v2793_v4  ;;  %v2812_v47 = vmul.f32 %v2808_v3, %v5029_v8  ;;  %v3150_v3 = vrot.slane %v4629_v59, %v4336_v32 }
0x31b9   :  { %2816 = vperm.xlu1 %4010, %v2811_v44  }
0x31bd   :  { %2819 = vperm.xlu1 %4010, %v2812_v47   ;;  %v3172_v47 = vrot.slane %v4713_v21, %v4336_v32  ;;  %v3158_v21 = vrot.slane %v3150_v3, %v4336_v32 }
0x31bf   :  { %v3173_v59 = vcombine.high %v3172_v47, %v3172_v47 }
0x31c1   :  { %2831 = vrot.lane.b32.xlu1 %v4993_v10, %s4192_s30 }
0x3238   :  { %v2817_v12 = vpop.permute.xlu1 %2816 }
0x3239   :  { %v2824_v22 = vrot.slane %v2817_v12, %v4361_v55 }
0x323b   :  { %v3399_v24 = vsel %vm3093_vm15, %v4966_v56, %v2824_v22 }
0x323c   :  { %3401 = vst.msk [vmem:[%s5202_s10] sm:$0xff] %vm518_vm6, %v3399_v24  ;;  %v2820_v63 = vpop.permute.xlu1 %2819  ;;  %v3216_v24 = vrot.slane %v4911_v14, %v4336_v32 }
0x323d   :  { %v2828_v15 = vrot.slane %v2820_v63, %v4361_v55  ;;  %v3104_v63 = vrot.slane %v4458_v17, %v4336_v32 }
0x323f   :  { %v3400_v26 = vsel %vm3093_vm15, %v4971_v34, %v2828_v15  ;;  %v2829_v16 = vsel %vm421_vm3, %v2828_v15, %v2824_v22  ;;  %v3194_v22 = vrot.slane %v4817_v60, %v4336_v32  ;;  %v3151_v15 = vcombine.high %v3150_v3, %v3150_v3 }
0x3240   :  { %3402 = vst.msk [vmem:[%s5202_s10 + $0x8] sm:$0xff] %vm518_vm6, %v3400_v26  ;;  %v2832_v5 = vpop.permute.xlu1 %2831  ;;  %v3180_v60 = vrot.slane %v3172_v47, %v4336_v32 }
0x3241   :  { %v2834_v56 = vsel %vm518_vm6, %v2829_v16, %v2832_v5  ;;  %v3195_v5 = vcombine.high %v3194_v22, %v3194_v22  ;;  %v3165_v14 = vrot.slane %v3151_v15, %v4336_v32  ;;  %v3202_v17 = vrot.slane %v3194_v22, %v4336_v32 }
0x3242   :  { %3852 = vmatmul.mubr.msk.f32.vlgmr.msra.gmra.mrb[16].mxu0 %vm526_vm7, %v2834_v56  ;;  %v3217_v56 = vcombine.high %v3216_v24, %v3216_v24 }
0x3315   :  { %v2904_v45 = vpop.f32.mrb[16].mxu0 }
0x3316   :  { %v2905_v19 = vadd.f32 %v4901_v49, %v2904_v45  ;;  %v3853_v58 = vpop.f32.mrb[17].mxu0  ;;  %v3105_v45 = vcombine.high %v3104_v63, %v3104_v63 }
0x3318   :  { %4147 = vtanh.f32 %v2905_v19  ;;  %v3463_v34 = vmul.f32 -1.442695, %v2905_v19 }
0x331a   :  { %4149 = vpow2.f32 %v3463_v34 }
0x3322   :  { %v4148_v9 = vpop.eup %4147 }
0x3323   :  { %2917 = vrot.lane.b32.xlu1 %v4148_v9, %s4190_s28  ;;  %v3224_v9 = vrot.slane %v3216_v24, %v4336_v32 }
0x3324   :  { %v4150_v23 = vpop.eup %4149 }
0x3325   :  { %v2911_v13 = vadd.f32 1.0, %v4150_v23  ;;  %v3290_v23 = vrot.slane %v3158_v21, %v4341_v37 }
0x3327   :  { %4151 = vrcp.f32 %v2911_v13  ;;  %v3209_v13 = vrot.slane %v3195_v5, %v4336_v32 }
0x3331   :  { %v5053_v62 = vpop.eup %4151 }
0x3395   :  { %v2918_v54 = vpop.permute.xlu1 %2917 }
0x3396   :  { %v2920_v1 = vmul.f32 %v5053_v62, %v2918_v54 }
0x3398   :  { %2922 = vrot.lane.b32.xlu1 %v2920_v1, %s4190_s28 }
0x339c   :  { %2935 = vperm.xlu1 %4010, %v4396_v39   ;;  %v2915_v39 = vmul.f32 %v5053_v62, %v4989_v57 }
0x33a0   :  { %2938 = vperm.xlu1 %4010, %v4399_v41  }
0x33a4   :  { %2953 = vperm.xlu1 %4010, %v4504_v40  }
0x33a8   :  { %2956 = vperm.xlu1 %4010, %v4507_v43  }
0x33ac   :  { %2971 = vperm.xlu1 %4010, %v4586_v0  }
0x33b0   :  { %2989 = vperm.xlu1 %4010, %v4674_v28  }
0x33b4   :  { %3007 = vperm.xlu1 %4010, %v4778_v20  }
0x33b8   :  { %3025 = vperm.xlu1 %4010, %v4867_v61  }
0x33bc   :  { %3043 = vperm.xlu1 %4010, %v4955_v50  }
0x33c0   :  { %3061 = vperm.xlu1 %4010, %v2793_v4  }
0x340a   :  { %v2923_v49 = vpop.permute.xlu1 %2922 }
0x340b   :  { %v2925_v41 = vadd.f32 %v2923_v49, %v2915_v39  ;;  %v3112_v39 = vrot.slane %v3104_v63, %v4336_v32  ;;  %v3300_v49 = vrot.slane %v3180_v60, %v4341_v37 }
0x340d   :  { %4153 = vtanh.f32 %v2925_v41  ;;  %v3231_v41 = vrot.slane %v3217_v56, %v4336_v32 }
0x3417   :  { %v4154_v40 = vpop.eup %4153 }
0x3418   :  { %2928 = vrot.lane.b32.xlu0 %v4154_v40, %s4190_s28 }
0x341b   :  { %v2936_v43 = vpop.permute.xlu1 %2935 }
0x341c   :  { %2974 = vperm.xlu0 %4009, %v4589_v6   ;;  %v2943_v18 = vrot.slane %v2936_v43, %v4361_v55  ;;  %v3119_v43 = vrot.slane %v3105_v45, %v4336_v32 }
0x341f   :  { %v2939_v0 = vpop.permute.xlu1 %2938 }
0x3420   :  { %2992 = vperm.xlu0 %4009, %v4677_v52   ;;  %v2947_v61 = vrot.slane %v2939_v0, %v4361_v55  ;;  %v3294_v0 = vrot.slane %v3165_v14, %v4341_v37 }
0x3423   :  { %v2954_v28 = vpop.permute.xlu1 %2953 }
0x3424   :  { %3010 = vperm.xlu0 %4009, %v4781_v2   ;;  %v2961_v2 = vrot.slane %v2954_v28, %v4361_v55  ;;  %v3310_v28 = vrot.slane %v3202_v17, %v4341_v37 }
0x3426   :  { %v3077_v11 = vsel %vm3076_vm10, %v2943_v18, %v2961_v2 }
0x3427   :  { %v2957_v20 = vpop.permute.xlu1 %2956 }
0x3428   :  { %v2965_v50 = vrot.slane %v2957_v20, %v4361_v55  ;;  %3028 = vperm.xlu0 %4009, %v4870_v7  }
0x342a   :  { %v5076_v57 = vsel %vm3076_vm10, %v2947_v61, %v2965_v50 }
0x342b   :  { %v2972_v42 = vpop.permute.xlu1 %2971 }
0x342c   :  { %3046 = vperm.xlu0 %4009, %v4958_v35   ;;  %v2979_v29 = vrot.slane %v2972_v42, %v4361_v55  ;;  %v3320_v42 = vrot.slane %v3224_v9, %v4341_v37 }
0x342e   :  { %v3080_v36 = vsel %vm3079_vm11, %v3077_v11, %v2979_v29  ;;  %v3324_v29 = vrot.slane %v3231_v41, %v4341_v37 }
0x342f   :  { %v2990_v6 = vpop.permute.xlu1 %2989 }
0x3430   :  { %3064 = vperm.xlu0 %4009, %v5029_v8   ;;  %v2997_v46 = vrot.slane %v2990_v6, %v4361_v55  ;;  %v3128_v8 = vrot.slane %v4541_v25, %v4336_v32  ;;  %v3238_v25 = vrot.slane %v4993_v10, %v4336_v32  ;;  %v3187_v10 = vrot.slane %v3173_v59, %v4336_v32 }
0x3432   :  { %v3083_v27 = vsel %vm3082_vm12, %v3080_v36, %v2997_v46  ;;  %v3129_v12 = vcombine.high %v3128_v8, %v3128_v8  ;;  %v3136_v26 = vrot.slane %v3128_v8, %v4336_v32  ;;  %v3239_v19 = vcombine.high %v3238_v25, %v3238_v25 }
0x3433   :  { %v3008_v52 = vpop.permute.xlu1 %3007  ;;  %v3246_v54 = vrot.slane %v3238_v25, %v4336_v32  ;;  %v3304_v50 = vrot.slane %v3187_v10, %v4341_v37 }
0x3434   :  { %v3015_v7 = vrot.slane %v3008_v52, %v4361_v55  ;;  %v3143_v16 = vrot.slane %v3129_v12, %v4336_v32  ;;  %v3280_v58 = vrot.slane %v3136_v26, %v4341_v37  ;;  %v3253_v20 = vrot.slane %v3239_v19, %v4336_v32 }
0x3436   :  { %v3085_v30 = vsel %vm530_vm5, %v3083_v27, %v3015_v7  ;;  %v3284_v34 = vrot.slane %v3143_v16, %v4341_v37  ;;  %v3347_v61 = vsel %vm3076_vm10, %v3112_v39, %v3280_v58  ;;  %v3334_v11 = vrot.slane %v3253_v20, %v4341_v37 }
0x3437   :  { %v3026_v51 = vpop.permute.xlu1 %3025  ;;  %v3349_v2 = vsel %vm3079_vm11, %v3347_v61, %v3290_v23 }
0x3438   :  { %v3033_v35 = vrot.slane %v3026_v51, %v4361_v55  ;;  %v3348_v52 = vsel %vm3076_vm10, %v3119_v43, %v3284_v34  ;;  %v3330_v51 = vrot.slane %v3246_v54, %v4341_v37  ;;  %v3351_v7 = vsel %vm3082_vm12, %v3349_v2, %v3300_v49 }
0x343a   :  { %v3088_v53 = vsel %vm3087_vm13, %v3085_v30, %v3033_v35  ;;  %v3350_v35 = vsel %vm3079_vm11, %v3348_v52, %v3294_v0 }
0x343b   :  { %v3044_v33 = vpop.permute.xlu1 %3043  ;;  %v3352_v30 = vsel %vm3082_vm12, %v3350_v35, %v3304_v50 }
0x343c   :  { %v3051_v38 = vrot.slane %v3044_v33, %v4361_v55  ;;  %v3353_v33 = vsel %vm530_vm5, %v3351_v7, %v3310_v28 }
0x343d   :  { %v3355_v27 = vsel %vm3087_vm13, %v3353_v33, %v3320_v42 }
0x343e   :  { %v3091_v4 = vsel %vm3090_vm14, %v3088_v53, %v3051_v38 }
0x343f   :  { %v3062_v31 = vpop.permute.xlu1 %3061 }
0x3440   :  { %v3069_v48 = vrot.slane %v3062_v31, %v4361_v55  ;;  %v3357_v31 = vsel %vm3090_vm14, %v3355_v27, %v3330_v51 }
0x3442   :  { %v3094_v44 = vsel %vm3093_vm15, %v3091_v4, %v3069_v48 }
0x3443   :  { %3096 = vst.msk [vmem:[%s5200_s8] sm:$0xff] %vm518_vm6, %v3094_v44 }
0x348a   :  { %v2929_v1 = vpop.permute.xlu0 %2928 }
0x348b   :  { %v2931_v40 = vmul.f32 %v5053_v62, %v2929_v1  ;;  %v3314_v62 = vrot.slane %v3209_v13, %v4341_v37 }
0x348d   :  { %v3261_v6 = vrot.slane %v2931_v40, %v4336_v32  ;;  %v3354_v53 = vsel %vm530_vm5, %v3352_v30, %v3314_v62 }
0x348e   :  { %v3356_v44 = vsel %vm3087_vm13, %v3354_v53, %v3324_v29 }
0x348f   :  { %v3262_v18 = vcombine.high %v3261_v6, %v3261_v6  ;;  %v3269_v46 = vrot.slane %v3261_v6, %v4336_v32 }
0x3491   :  { %v3276_v36 = vrot.slane %v3262_v18, %v4336_v32  ;;  %v3340_v38 = vrot.slane %v3269_v46, %v4341_v37  ;;  %v3358_v32 = vsel %vm3090_vm14, %v3356_v44, %v3334_v11 }
0x3493   :  { %v3359_v48 = vsel %vm3093_vm15, %v3357_v31, %v3340_v38  ;;  %v3344_v4 = vrot.slane %v3276_v36, %v4341_v37 }
0x3494   :  { %3363 = vrot.lane.b32.xlu1 %v3359_v48, %s4191_s29 }
0x3495   :  { %v3360_v8 = vsel %vm3093_vm15, %v3358_v32, %v3344_v4 }
0x3496   :  { %3365 = vrot.lane.b32.xlu0 %v3360_v8, %s4191_s29 }
0x349b   :  { %v2975_v3 = vpop.permute.xlu0 %2974 }
0x349c   :  { %v2983_v24 = vrot.slane %v2975_v3, %v4361_v55 }
0x349e   :  { %v3081_v26 = vsel %vm3079_vm11, %v5076_v57, %v2983_v24 }
0x349f   :  { %v2993_v47 = vpop.permute.xlu0 %2992 }
0x34a0   :  { %v3001_v63 = vrot.slane %v2993_v47, %v4361_v55 }
0x34a2   :  { %v3084_v16 = vsel %vm3082_vm12, %v3081_v26, %v3001_v63 }
0x34a3   :  { %v3011_v12 = vpop.permute.xlu0 %3010 }
0x34a4   :  { %v3019_v37 = vrot.slane %v3011_v12, %v4361_v55 }
0x34a6   :  { %v3086_v21 = vsel %vm530_vm5, %v3084_v16, %v3019_v37 }
0x34a7   :  { %v3029_v22 = vpop.permute.xlu0 %3028 }
0x34a8   :  { %v3037_v25 = vrot.slane %v3029_v22, %v4361_v55 }
0x34aa   :  { %v3089_v60 = vsel %vm3087_vm13, %v3086_v21, %v3037_v25 }
0x34ab   :  { %v3047_v15 = vpop.permute.xlu0 %3046 }
0x34ac   :  { %v3055_v59 = vrot.slane %v3047_v15, %v4361_v55 }
0x34ae   :  { %v3092_v45 = vsel %vm3090_vm14, %v3089_v60, %v3055_v59 }
0x34af   :  { %v3065_v5 = vpop.permute.xlu0 %3064 }
0x34b0   :  { %v3073_v56 = vrot.slane %v3065_v5, %v4361_v55 }
0x34b2   :  { %v3095_v14 = vsel %vm3093_vm15, %v3092_v45, %v3073_v56 }
0x34b3   :  { %3097 = vst.msk [vmem:[%s5200_s8 + $0x8] sm:$0xff] %vm518_vm6, %v3095_v14 }
0x3506   :  { %v3364_v57 = vpop.permute.xlu1 %3363 }
0x3507   :  { %3369 = vst.msk [vmem:[#allocation3] sm:$0xff] %vm632_vm8, %v3364_v57 }
0x3508   :  { %v3366_v17 = vpop.permute.xlu0 %3365 }
0x3509   :  { %3370 = vst.msk [vmem:[#allocation3 + $0x8] sm:$0xff] %vm632_vm8, %v3366_v17 }
0x350a   :  { %4172 = shalt.err (!%p4169_p4)
}
0x350b   :  { %s4173_s8 = scalar_lea.hbm %s5201_s9, 256 }
0x350c   :  { %p4174_p5 = scmp.ne.s32.totalorder %s5201_s9, %s4173_s8  ;;  %p4177_p6 = scmp.lt.u32.totalorder %s4173_s8, %s5201_s9 }
0x350e   :  { %p4179_p7 = pnand %p4177_p6, %p4174_p5 }
0x3510   :  { %4182 = shalt.err (!%p4179_p7)
}
0x3511   :  { %s4194_s11 = smov 128   ;;  %s4195_s12 = smov 8  }
0x3512   :  { %3416 = dma.vmem_to_hbm [thread:$0]  %s3411_s23, 256, %s5201_s9, [#allocation4], %s4194_s11, %s4194_s11, %s4195_s12  }
0x3513   :  { %4183 = dma.done.wait [#allocation4], 256  }
0x3514   :  { %4184 = vsyncadd [#allocation4], 4294967040 }
0x3515   :  { %3426 = vsyncpa [#allocation4], 1 }

</bundles_post_ra>
